<compile_context>
chip_gen: v7x
topology: tpu7x:2x2x1
jax: 0.10.0
libtpu: 0.0.40
codegen_flags: <defaults>
</compile_context>

<pallas_src>
import jax
import jax.numpy as jnp
from jax.experimental import pallas as pl
from jax.experimental.pallas import tpu as pltpu

DEGREE = 3
NCOEF = 10
NKNOT = NCOEF + DEGREE + 1        # 14 knots: linspace(0, 1, 14)
KNOT_SCALE = float(NKNOT - 1)     # uniform knots: t[i] = i / 13
LANE = 128


def _round_up(x, m):
    return (x + m - 1) // m * m


def _sublane_pack(dtype):
    # rows per packed sublane group: 8 for 4-byte types, 16 for 2-byte types
    return 8 * (4 // jnp.dtype(dtype).itemsize)


# ----------------------------- spline / column math -----------------------------

def _bspline_pieces(x):
    """Knot-span index m (exact integer-valued f32) and the DEGREE+1 nonzero
    Cox-de Boor basis values; basis[r] multiplies coefficient index (m - DEGREE + r).
    Matches scipy BSpline with extrapolate=True (span clamped to [DEGREE, NCOEF-1])."""
    m = jnp.full(x.shape, float(DEGREE), jnp.float32)
    for i in range(DEGREE + 1, NCOEF):
        m = m + (x >= (i / KNOT_SCALE)).astype(jnp.float32)
    basis = [jnp.ones_like(x)]
    for j in range(1, DEGREE + 1):
        inv_denom = KNOT_SCALE / j            # uniform knots -> denominator = j/13
        saved = jnp.zeros_like(x)
        new = []
        for r in range(j):
            right = (m + (r + 1)) / KNOT_SCALE - x
            left = x - (m + 1.0 - (j - r)) / KNOT_SCALE
            temp = basis[r] * inv_denom
            new.append(saved + right * temp)
            saved = left * temp
        new.append(saved)
        basis = new
    return m, basis


def _phi_columns(x, *, approx_silu=False):
    """Returns [silu(x), b_0(x), ..., b_{NCOEF-1}(x)], each of x.shape. The 7 knot-span
    one-hot masks are computed once and reused. approx_silu routes the sigmoid
    denominator to the EUP reciprocal (Pallas-only)."""
    if approx_silu:
        sig = pl.reciprocal(1.0 + jnp.exp(-x), approx=True)
    else:
        sig = 1.0 / (1.0 + jnp.exp(-x))
    silu = x * sig
    m, basis = _bspline_pieces(x)
    masks = [(m == float(s)).astype(jnp.float32) for s in range(DEGREE, NCOEF)]
    cols = [silu]
    for l in range(NCOEF):
        b_l = None
        for r in range(DEGREE + 1):
            s = l + DEGREE - r                 # span in which coeff l uses basis[r]
            if DEGREE <= s < NCOEF:
                term = basis[r] * masks[s - DEGREE]
                b_l = term if b_l is None else b_l + term
        cols.append(b_l)
    return cols


# --------------------------------- Pallas kernel ---------------------------------

def _make_stack_kernel(layer_dims, approx_silu):
    """Fused multi-layer KAN kernel (transposed dataflow, batch in lanes).
    layer_dims: list of (in_p, k_p, out_rows) per layer."""
    n_layers = len(layer_dims)

    def kernel(xT_ref, *refs):
        w_refs = refs[:n_layers]             # (out_rows, k_p) in dot dtype
        oT_ref = refs[n_layers]              # (out_rows_last, tn) f32
        b_refs = refs[n_layers + 1:]         # per-layer (k_p, tn) scratch, dot dtype
        act = xT_ref[...]                    # (in_p0, tn) f32
        for li, (in_p, k_p, out_rows) in enumerate(layer_dims):
            cols = _phi_columns(act, approx_silu=approx_silu)
            b = b_refs[li]
            # Aligned, unmasked (in_p, tn) block stores in the dot dtype.
            for l, col in enumerate(cols):
                b[l * in_p:(l + 1) * in_p, :] = col.astype(b.dtype)
            # Single wide-K MXU matmul per layer: out^T = W^T @ B^T, f32 accumulation.
            act = jnp.dot(w_refs[li][...], b[...],
                          preferred_element_type=jnp.float32)
        oT_ref[...] = act                    # lane-dense (batch in lanes) store

    return kernel


# ------------------------------ host-side preparation -----------------------------

def init_kan_params(key, layer_sizes):
    params = []
    for i in range(len(layer_sizes) - 1):
        in_dim, out_dim = layer_sizes[i], layer_sizes[i + 1]
        key, k1, k2 = jax.random.split(key, 3)
        # Shapes follow the PyTorch module: one (w_basis, w_spline, coefficients)
        # triple per (i, j) edge. w_basis ~ U(-1, 1), w_spline = 1 (as in __init__).
        w_basis = jax.random.uniform(k1, (in_dim, out_dim), jnp.float32, -1.0, 1.0)
        w_spline = jnp.ones((in_dim, out_dim), jnp.float32)
        # NOTE: the PyTorch module initializes coefficients to zeros; small random
        # values are used here so the B-spline path is actually exercised.
        coeffs = 0.1 * jax.random.normal(k2, (in_dim, out_dim, NCOEF), jnp.float32)
        params.append((w_basis, w_spline, coeffs))
    return params


def prepare_kan(params, dot_dtype=jnp.bfloat16):
    """Fold w_spline into the spline coefficients and pack every layer into a
    transposed slab W^T of shape (out_rows, (NCOEF+1)*in_p). in_dim is padded to the
    scratch sublane packing; non-final out_dim is padded to the next layer's in_p so
    activations flow between layers without re-padding. Done ONCE, outside forward."""
    pack = _sublane_pack(dot_dtype)
    layers = []
    for li, (w_basis, w_spline, coeffs) in enumerate(params):
        in_dim, out_dim = w_basis.shape
        if li > 0:
            assert in_dim == params[li - 1][0].shape[1]
        in_p = _round_up(in_dim, pack)
        last = li == len(params) - 1
        out_rows = out_dim if last else _round_up(out_dim, pack)
        wsc = jnp.transpose(w_spline[:, :, None] * coeffs, (2, 0, 1))   # (NCOEF, in, out)
        w = jnp.concatenate([w_basis[None].astype(jnp.float32),
                             wsc.astype(jnp.float32)], axis=0)          # (NCOEF+1, in, out)
        w = jnp.pad(w, ((0, 0), (0, in_p - in_dim), (0, out_rows - out_dim)))
        wT = jnp.transpose(w, (2, 0, 1)).reshape(out_rows, (NCOEF + 1) * in_p)
        layers.append(dict(wT=wT.astype(dot_dtype), in_dim=in_dim, in_p=in_p,
                           out_dim=out_dim, out_rows=out_rows,
                           k_p=(NCOEF + 1) * in_p))
    return layers


def kan_forward(x, layers, *, tile_n=512, approx_silu=None,
                vmem_budget_bytes=40 * 1024 * 1024):
    """Fused forward pass of the whole KAN stack in a single pallas_call."""
    # TODO(synk): for very large stacks whose weight slabs alone exceed the VMEM
    # budget, fall back to one pallas_call per layer instead of the fused stack.
    n, in0 = x.shape
    assert in0 == layers[0]['in_dim']
    dot_dtype = jnp.dtype(layers[0]['wT'].dtype)
    if approx_silu is None:
        approx_silu = dot_dtype != jnp.dtype(jnp.float32)
    in_p0 = layers[0]['in_p']
    out_last = layers[-1]['out_dim']

    def vmem_need(tn_):
        # x tile + out tile double-buffered (f32), weight slabs counted at 2x (the
        # default pipeline double-buffers even constant-index blocks), plus the
        # per-layer B^T scratch in the dot dtype.
        b = 2 * in_p0 * tn_ * 4 + 2 * out_last * tn_ * 4
        for L in layers:
            wbytes = int(L['wT'].size) * L['wT'].dtype.itemsize
            b += 2 * wbytes + L['k_p'] * tn_ * L['wT'].dtype.itemsize
        return b

    # Pick the batch tile: multiple of 128 (lane-dense), >= 2 grid steps when the
    # batch allows it (both v7x TensorCores), capped by the VMEM budget.
    n_ceil = _round_up(max(n, 1), LANE)
    tn = min(_round_up(tile_n, LANE), n_ceil)
    if n_ceil // tn < 2 and n_ceil >= 2 * LANE:
        tn = max(LANE, _round_up(n_ceil // 2, LANE))
    while tn > LANE and vmem_need(tn) > vmem_budget_bytes:
        tn = max(LANE, _round_up(tn // 2, LANE))

    n_pad = _round_up(n, tn)
    xT = jnp.zeros((in_p0, n_pad), jnp.float32)
    xT = xT.at[:in0, :n].set(jnp.transpose(x).astype(jnp.float32))

    layer_dims = [(L['in_p'], L['k_p'], L['out_rows']) for L in layers]
    kernel = _make_stack_kernel(layer_dims, approx_silu)

    in_specs = [pl.BlockSpec((in_p0, tn), lambda i: (0, i))]        # batch tile
    for L in layers:
        in_specs.append(pl.BlockSpec(L['wT'].shape, lambda i: (0, 0)))  # resident slab
    out_specs = pl.BlockSpec((out_last, tn), lambda i: (0, i))
    scratch_shapes = [pltpu.VMEM((L['k_p'], tn), dot_dtype) for L in layers]

    vmem_limit = int(min(48 * 1024 * 1024,
                         max(32 * 1024 * 1024, 2 * vmem_need(tn))))

    oT = pl.pallas_call(
        kernel,
        out_shape=jax.ShapeDtypeStruct((out_last, n_pad), jnp.float32),
        grid=(n_pad // tn,),
        in_specs=in_specs,
        out_specs=out_specs,
        scratch_shapes=scratch_shapes,
        compiler_params=pltpu.CompilerParams(
            dimension_semantics=("parallel",),
            vmem_limit_bytes=vmem_limit,
        ),
    )(xT, *[L['wT'] for L in layers])
    return jnp.transpose(oT[:, :n])


# ------------------------- pure-JAX references (for checks) -------------------------

def kan_layer_ref_packed(x, w_basis, w_spline, coeffs, dot_dtype=jnp.float32):
    """Reference mirroring the kernel's column/weight packing and dot dtype."""
    in_dim, out_dim = w_basis.shape
    cols = _phi_columns(x.astype(jnp.float32))               # exact silu
    b = jnp.concatenate(cols, axis=-1).astype(dot_dtype)     # (n, (NCOEF+1)*in)
    wsc = jnp.transpose(w_spline[:, :, None] * coeffs, (2, 0, 1))
    w = jnp.concatenate([w_basis[None].astype(jnp.float32),
                         wsc.astype(jnp.float32)], axis=0)
    w = w.reshape((NCOEF + 1) * in_dim, out_dim).astype(dot_dtype)
    return jnp.dot(b, w, preferred_element_type=jnp.float32)


def kan_layer_ref_direct(x, w_basis, w_spline, coeffs):
    """Independent f32 per-edge reference (no packing), for a semantic check."""
    x = x.astype(jnp.float32)
    silu = x * (1.0 / (1.0 + jnp.exp(-x)))
    m, basis = _bspline_pieces(x)
    bfull = jnp.zeros(x.shape + (NCOEF,), jnp.float32)
    for l in range(NCOEF):
        for r in range(DEGREE + 1):
            s = l + DEGREE - r
            if DEGREE <= s < NCOEF:
                bfull = bfull.at[..., l].add(
                    basis[r] * (m == float(s)).astype(jnp.float32))
    spline = jnp.einsum("nil,ijl->nj", bfull, w_spline[:, :, None] * coeffs,
                        precision=jax.lax.Precision.HIGHEST)
    return jnp.dot(silu, w_basis, precision=jax.lax.Precision.HIGHEST) + spline


if __name__ == "__main__":
    layer_sizes = [4, 32, 8]
    batch = 256          # tile picker -> tn=128, grid of 2 "parallel" batch tiles

    key = jax.random.PRNGKey(0)
    kx, kp = jax.random.split(key)
    x = jax.random.uniform(kx, (batch, layer_sizes[0]), jnp.float32)
    params = init_kan_params(kp, layer_sizes)

    # ---- fast path: bf16 MXU operands + bf16 B^T scratch, f32 accumulation ----
    layers_bf16 = prepare_kan(params, jnp.bfloat16)
    out = jax.block_until_ready(kan_forward(x, layers_bf16, tile_n=512))
    assert out.shape == (batch, layer_sizes[-1])

    ref = x
    for wb, ws, c in params:
        ref = kan_layer_ref_packed(ref, wb, ws, c, dot_dtype=jnp.bfloat16)
    scale = float(jnp.max(jnp.abs(ref))) + 1e-6
    err = float(jnp.max(jnp.abs(out - ref)))
    assert err <= 5e-2 * scale, f"bf16 path mismatch: max abs err {err}, scale {scale}"

    # ---- f32 fidelity path: check against an independent per-edge reference ----
    layers_f32 = prepare_kan(params, jnp.float32)
    out32 = jax.block_until_ready(kan_forward(x, layers_f32, tile_n=512))
    ref32 = x
    for wb, ws, c in params:
        ref32 = kan_layer_ref_direct(ref32, wb, ws, c)
    scale32 = float(jnp.max(jnp.abs(ref32))) + 1e-6
    err32 = float(jnp.max(jnp.abs(out32 - ref32)))
    assert err32 <= 1e-2 * scale32, f"f32 path mismatch: max abs err {err32}, scale {scale32}"

    print("KERNEL_OK")
</pallas_src>

<mosaic_0001>
module attributes {stable_mosaic.version = 11 : i64} {
  func.func @kernel(%arg0: i32, %arg1: memref<16x128xf32, #tpu.memory_space<vmem>>, %arg2: memref<32x176xbf16, #tpu.memory_space<vmem>>, %arg3: memref<8x352xbf16, #tpu.memory_space<vmem>>, %arg4: memref<8x128xf32, #tpu.memory_space<vmem>>, %arg5: memref<176x128xbf16, #tpu.memory_space<vmem>>, %arg6: memref<352x128xbf16, #tpu.memory_space<vmem>>) attributes {dimension_semantics = [#tpu.dimension_semantics<parallel>], iteration_bounds = array<i64: 2>, scalar_prefetch = 0 : i64, scratch_operands = 2 : i64, tpu.core_type = #tpu.core_type<tc>, window_params = [{transform_indices = @transform_0, window_bounds = array<i64: 16, 128>}, {pipeline_mode = #tpu.pipeline_mode<synchronous>, transform_indices = @transform_1, window_bounds = array<i64: 32, 176>}, {pipeline_mode = #tpu.pipeline_mode<synchronous>, transform_indices = @transform_2, window_bounds = array<i64: 8, 352>}, {transform_indices = @transform_3, window_bounds = array<i64: 8, 128>}]} {
    %c0 = arith.constant 0 : index
    %c0_0 = arith.constant 0 : index
    %0 = vector.load %arg1[%c0, %c0_0] : memref<16x128xf32, #tpu.memory_space<vmem>>, vector<16x128xf32>
    %cst = arith.constant 0.000000e+00 : f32
    %1 = vector.broadcast %cst : f32 to vector<16x128xf32>
    %2 = arith.subf %1, %0 : vector<16x128xf32>
    %3 = math.exp %2 : vector<16x128xf32>
    %cst_1 = arith.constant 1.000000e+00 : f32
    %4 = vector.broadcast %cst_1 : f32 to vector<16x128xf32>
    %5 = arith.addf %4, %3 : vector<16x128xf32>
    %6 = tpu.reciprocal %5 {approx = true} : vector<16x128xf32> -> vector<16x128xf32>
    %7 = arith.mulf %0, %6 : vector<16x128xf32>
    %cst_2 = arith.constant 3.000000e+00 : f32
    %8 = vector.broadcast %cst_2 : f32 to vector<16x128xf32>
    %cst_3 = arith.constant 0.307692319 : f32
    %9 = vector.broadcast %cst_3 : f32 to vector<16x128xf32>
    %10 = arith.cmpf oge, %0, %9 : vector<16x128xf32>
    %11 = arith.extui %10 : vector<16x128xi1> to vector<16x128xi32>
    %12 = arith.sitofp %11 : vector<16x128xi32> to vector<16x128xf32>
    %13 = arith.addf %8, %12 : vector<16x128xf32>
    %cst_4 = arith.constant 0.384615391 : f32
    %14 = vector.broadcast %cst_4 : f32 to vector<16x128xf32>
    %15 = arith.cmpf oge, %0, %14 : vector<16x128xf32>
    %16 = arith.extui %15 : vector<16x128xi1> to vector<16x128xi32>
    %17 = arith.sitofp %16 : vector<16x128xi32> to vector<16x128xf32>
    %18 = arith.addf %13, %17 : vector<16x128xf32>
    %cst_5 = arith.constant 0.461538464 : f32
    %19 = vector.broadcast %cst_5 : f32 to vector<16x128xf32>
    %20 = arith.cmpf oge, %0, %19 : vector<16x128xf32>
    %21 = arith.extui %20 : vector<16x128xi1> to vector<16x128xi32>
    %22 = arith.sitofp %21 : vector<16x128xi32> to vector<16x128xf32>
    %23 = arith.addf %18, %22 : vector<16x128xf32>
    %cst_6 = arith.constant 0.538461566 : f32
    %24 = vector.broadcast %cst_6 : f32 to vector<16x128xf32>
    %25 = arith.cmpf oge, %0, %24 : vector<16x128xf32>
    %26 = arith.extui %25 : vector<16x128xi1> to vector<16x128xi32>
    %27 = arith.sitofp %26 : vector<16x128xi32> to vector<16x128xf32>
    %28 = arith.addf %23, %27 : vector<16x128xf32>
    %cst_7 = arith.constant 0.615384638 : f32
    %29 = vector.broadcast %cst_7 : f32 to vector<16x128xf32>
    %30 = arith.cmpf oge, %0, %29 : vector<16x128xf32>
    %31 = arith.extui %30 : vector<16x128xi1> to vector<16x128xi32>
    %32 = arith.sitofp %31 : vector<16x128xi32> to vector<16x128xf32>
    %33 = arith.addf %28, %32 : vector<16x128xf32>
    %cst_8 = arith.constant 0.692307711 : f32
    %34 = vector.broadcast %cst_8 : f32 to vector<16x128xf32>
    %35 = arith.cmpf oge, %0, %34 : vector<16x128xf32>
    %36 = arith.extui %35 : vector<16x128xi1> to vector<16x128xi32>
    %37 = arith.sitofp %36 : vector<16x128xi32> to vector<16x128xf32>
    %38 = arith.addf %33, %37 : vector<16x128xf32>
    %cst_9 = arith.constant 1.000000e+00 : f32
    %39 = vector.broadcast %cst_9 : f32 to vector<16x128xf32>
    %cst_10 = arith.constant 0.000000e+00 : f32
    %40 = vector.broadcast %cst_10 : f32 to vector<16x128xf32>
    %cst_11 = arith.constant 1.000000e+00 : f32
    %41 = vector.broadcast %cst_11 : f32 to vector<16x128xf32>
    %42 = arith.addf %38, %41 : vector<16x128xf32>
    %cst_12 = arith.constant 1.300000e+01 : f32
    %43 = vector.broadcast %cst_12 : f32 to vector<16x128xf32>
    %44 = arith.divf %42, %43 : vector<16x128xf32>
    %45 = arith.subf %44, %0 : vector<16x128xf32>
    %cst_13 = arith.constant 1.000000e+00 : f32
    %46 = vector.broadcast %cst_13 : f32 to vector<16x128xf32>
    %47 = arith.addf %38, %46 : vector<16x128xf32>
    %cst_14 = arith.constant 1.000000e+00 : f32
    %48 = vector.broadcast %cst_14 : f32 to vector<16x128xf32>
    %49 = arith.subf %47, %48 : vector<16x128xf32>
    %cst_15 = arith.constant 1.300000e+01 : f32
    %50 = vector.broadcast %cst_15 : f32 to vector<16x128xf32>
    %51 = arith.divf %49, %50 : vector<16x128xf32>
    %52 = arith.subf %0, %51 : vector<16x128xf32>
    %cst_16 = arith.constant 1.300000e+01 : f32
    %53 = vector.broadcast %cst_16 : f32 to vector<16x128xf32>
    %54 = arith.mulf %39, %53 : vector<16x128xf32>
    %55 = arith.mulf %45, %54 : vector<16x128xf32>
    %56 = arith.addf %40, %55 : vector<16x128xf32>
    %57 = arith.mulf %52, %54 : vector<16x128xf32>
    %cst_17 = arith.constant 0.000000e+00 : f32
    %58 = vector.broadcast %cst_17 : f32 to vector<16x128xf32>
    %cst_18 = arith.constant 1.000000e+00 : f32
    %59 = vector.broadcast %cst_18 : f32 to vector<16x128xf32>
    %60 = arith.addf %38, %59 : vector<16x128xf32>
    %cst_19 = arith.constant 1.300000e+01 : f32
    %61 = vector.broadcast %cst_19 : f32 to vector<16x128xf32>
    %62 = arith.divf %60, %61 : vector<16x128xf32>
    %63 = arith.subf %62, %0 : vector<16x128xf32>
    %cst_20 = arith.constant 1.000000e+00 : f32
    %64 = vector.broadcast %cst_20 : f32 to vector<16x128xf32>
    %65 = arith.addf %38, %64 : vector<16x128xf32>
    %cst_21 = arith.constant 2.000000e+00 : f32
    %66 = vector.broadcast %cst_21 : f32 to vector<16x128xf32>
    %67 = arith.subf %65, %66 : vector<16x128xf32>
    %cst_22 = arith.constant 1.300000e+01 : f32
    %68 = vector.broadcast %cst_22 : f32 to vector<16x128xf32>
    %69 = arith.divf %67, %68 : vector<16x128xf32>
    %70 = arith.subf %0, %69 : vector<16x128xf32>
    %cst_23 = arith.constant 6.500000e+00 : f32
    %71 = vector.broadcast %cst_23 : f32 to vector<16x128xf32>
    %72 = arith.mulf %56, %71 : vector<16x128xf32>
    %73 = arith.mulf %63, %72 : vector<16x128xf32>
    %74 = arith.addf %58, %73 : vector<16x128xf32>
    %75 = arith.mulf %70, %72 : vector<16x128xf32>
    %cst_24 = arith.constant 2.000000e+00 : f32
    %76 = vector.broadcast %cst_24 : f32 to vector<16x128xf32>
    %77 = arith.addf %38, %76 : vector<16x128xf32>
    %cst_25 = arith.constant 1.300000e+01 : f32
    %78 = vector.broadcast %cst_25 : f32 to vector<16x128xf32>
    %79 = arith.divf %77, %78 : vector<16x128xf32>
    %80 = arith.subf %79, %0 : vector<16x128xf32>
    %cst_26 = arith.constant 1.000000e+00 : f32
    %81 = vector.broadcast %cst_26 : f32 to vector<16x128xf32>
    %82 = arith.addf %38, %81 : vector<16x128xf32>
    %cst_27 = arith.constant 1.000000e+00 : f32
    %83 = vector.broadcast %cst_27 : f32 to vector<16x128xf32>
    %84 = arith.subf %82, %83 : vector<16x128xf32>
    %cst_28 = arith.constant 1.300000e+01 : f32
    %85 = vector.broadcast %cst_28 : f32 to vector<16x128xf32>
    %86 = arith.divf %84, %85 : vector<16x128xf32>
    %87 = arith.subf %0, %86 : vector<16x128xf32>
    %cst_29 = arith.constant 6.500000e+00 : f32
    %88 = vector.broadcast %cst_29 : f32 to vector<16x128xf32>
    %89 = arith.mulf %57, %88 : vector<16x128xf32>
    %90 = arith.mulf %80, %89 : vector<16x128xf32>
    %91 = arith.addf %75, %90 : vector<16x128xf32>
    %92 = arith.mulf %87, %89 : vector<16x128xf32>
    %cst_30 = arith.constant 0.000000e+00 : f32
    %93 = vector.broadcast %cst_30 : f32 to vector<16x128xf32>
    %cst_31 = arith.constant 1.000000e+00 : f32
    %94 = vector.broadcast %cst_31 : f32 to vector<16x128xf32>
    %95 = arith.addf %38, %94 : vector<16x128xf32>
    %cst_32 = arith.constant 1.300000e+01 : f32
    %96 = vector.broadcast %cst_32 : f32 to vector<16x128xf32>
    %97 = arith.divf %95, %96 : vector<16x128xf32>
    %98 = arith.subf %97, %0 : vector<16x128xf32>
    %cst_33 = arith.constant 1.000000e+00 : f32
    %99 = vector.broadcast %cst_33 : f32 to vector<16x128xf32>
    %100 = arith.addf %38, %99 : vector<16x128xf32>
    %cst_34 = arith.constant 3.000000e+00 : f32
    %101 = vector.broadcast %cst_34 : f32 to vector<16x128xf32>
    %102 = arith.subf %100, %101 : vector<16x128xf32>
    %cst_35 = arith.constant 1.300000e+01 : f32
    %103 = vector.broadcast %cst_35 : f32 to vector<16x128xf32>
    %104 = arith.divf %102, %103 : vector<16x128xf32>
    %105 = arith.subf %0, %104 : vector<16x128xf32>
    %cst_36 = arith.constant 4.33333349 : f32
    %106 = vector.broadcast %cst_36 : f32 to vector<16x128xf32>
    %107 = arith.mulf %74, %106 : vector<16x128xf32>
    %108 = arith.mulf %98, %107 : vector<16x128xf32>
    %109 = arith.addf %93, %108 : vector<16x128xf32>
    %110 = arith.mulf %105, %107 : vector<16x128xf32>
    %cst_37 = arith.constant 2.000000e+00 : f32
    %111 = vector.broadcast %cst_37 : f32 to vector<16x128xf32>
    %112 = arith.addf %38, %111 : vector<16x128xf32>
    %cst_38 = arith.constant 1.300000e+01 : f32
    %113 = vector.broadcast %cst_38 : f32 to vector<16x128xf32>
    %114 = arith.divf %112, %113 : vector<16x128xf32>
    %115 = arith.subf %114, %0 : vector<16x128xf32>
    %cst_39 = arith.constant 1.000000e+00 : f32
    %116 = vector.broadcast %cst_39 : f32 to vector<16x128xf32>
    %117 = arith.addf %38, %116 : vector<16x128xf32>
    %cst_40 = arith.constant 2.000000e+00 : f32
    %118 = vector.broadcast %cst_40 : f32 to vector<16x128xf32>
    %119 = arith.subf %117, %118 : vector<16x128xf32>
    %cst_41 = arith.constant 1.300000e+01 : f32
    %120 = vector.broadcast %cst_41 : f32 to vector<16x128xf32>
    %121 = arith.divf %119, %120 : vector<16x128xf32>
    %122 = arith.subf %0, %121 : vector<16x128xf32>
    %cst_42 = arith.constant 4.33333349 : f32
    %123 = vector.broadcast %cst_42 : f32 to vector<16x128xf32>
    %124 = arith.mulf %91, %123 : vector<16x128xf32>
    %125 = arith.mulf %115, %124 : vector<16x128xf32>
    %126 = arith.addf %110, %125 : vector<16x128xf32>
    %127 = arith.mulf %122, %124 : vector<16x128xf32>
    %cst_43 = arith.constant 3.000000e+00 : f32
    %128 = vector.broadcast %cst_43 : f32 to vector<16x128xf32>
    %129 = arith.addf %38, %128 : vector<16x128xf32>
    %cst_44 = arith.constant 1.300000e+01 : f32
    %130 = vector.broadcast %cst_44 : f32 to vector<16x128xf32>
    %131 = arith.divf %129, %130 : vector<16x128xf32>
    %132 = arith.subf %131, %0 : vector<16x128xf32>
    %cst_45 = arith.constant 1.000000e+00 : f32
    %133 = vector.broadcast %cst_45 : f32 to vector<16x128xf32>
    %134 = arith.addf %38, %133 : vector<16x128xf32>
    %cst_46 = arith.constant 1.000000e+00 : f32
    %135 = vector.broadcast %cst_46 : f32 to vector<16x128xf32>
    %136 = arith.subf %134, %135 : vector<16x128xf32>
    %cst_47 = arith.constant 1.300000e+01 : f32
    %137 = vector.broadcast %cst_47 : f32 to vector<16x128xf32>
    %138 = arith.divf %136, %137 : vector<16x128xf32>
    %139 = arith.subf %0, %138 : vector<16x128xf32>
    %cst_48 = arith.constant 4.33333349 : f32
    %140 = vector.broadcast %cst_48 : f32 to vector<16x128xf32>
    %141 = arith.mulf %92, %140 : vector<16x128xf32>
    %142 = arith.mulf %132, %141 : vector<16x128xf32>
    %143 = arith.addf %127, %142 : vector<16x128xf32>
    %144 = arith.mulf %139, %141 : vector<16x128xf32>
    %cst_49 = arith.constant 3.000000e+00 : f32
    %145 = vector.broadcast %cst_49 : f32 to vector<16x128xf32>
    %146 = arith.cmpf oeq, %38, %145 : vector<16x128xf32>
    %147 = arith.extui %146 : vector<16x128xi1> to vector<16x128xi32>
    %148 = arith.sitofp %147 : vector<16x128xi32> to vector<16x128xf32>
    %cst_50 = arith.constant 4.000000e+00 : f32
    %149 = vector.broadcast %cst_50 : f32 to vector<16x128xf32>
    %150 = arith.cmpf oeq, %38, %149 : vector<16x128xf32>
    %151 = arith.extui %150 : vector<16x128xi1> to vector<16x128xi32>
    %152 = arith.sitofp %151 : vector<16x128xi32> to vector<16x128xf32>
    %cst_51 = arith.constant 5.000000e+00 : f32
    %153 = vector.broadcast %cst_51 : f32 to vector<16x128xf32>
    %154 = arith.cmpf oeq, %38, %153 : vector<16x128xf32>
    %155 = arith.extui %154 : vector<16x128xi1> to vector<16x128xi32>
    %156 = arith.sitofp %155 : vector<16x128xi32> to vector<16x128xf32>
    %cst_52 = arith.constant 6.000000e+00 : f32
    %157 = vector.broadcast %cst_52 : f32 to vector<16x128xf32>
    %158 = arith.cmpf oeq, %38, %157 : vector<16x128xf32>
    %159 = arith.extui %158 : vector<16x128xi1> to vector<16x128xi32>
    %160 = arith.sitofp %159 : vector<16x128xi32> to vector<16x128xf32>
    %cst_53 = arith.constant 7.000000e+00 : f32
    %161 = vector.broadcast %cst_53 : f32 to vector<16x128xf32>
    %162 = arith.cmpf oeq, %38, %161 : vector<16x128xf32>
    %163 = arith.extui %162 : vector<16x128xi1> to vector<16x128xi32>
    %164 = arith.sitofp %163 : vector<16x128xi32> to vector<16x128xf32>
    %cst_54 = arith.constant 8.000000e+00 : f32
    %165 = vector.broadcast %cst_54 : f32 to vector<16x128xf32>
    %166 = arith.cmpf oeq, %38, %165 : vector<16x128xf32>
    %167 = arith.extui %166 : vector<16x128xi1> to vector<16x128xi32>
    %168 = arith.sitofp %167 : vector<16x128xi32> to vector<16x128xf32>
    %cst_55 = arith.constant 9.000000e+00 : f32
    %169 = vector.broadcast %cst_55 : f32 to vector<16x128xf32>
    %170 = arith.cmpf oeq, %38, %169 : vector<16x128xf32>
    %171 = arith.extui %170 : vector<16x128xi1> to vector<16x128xi32>
    %172 = arith.sitofp %171 : vector<16x128xi32> to vector<16x128xf32>
    %173 = arith.mulf %109, %148 : vector<16x128xf32>
    %174 = arith.mulf %109, %152 : vector<16x128xf32>
    %175 = arith.mulf %126, %148 : vector<16x128xf32>
    %176 = arith.addf %174, %175 : vector<16x128xf32>
    %177 = arith.mulf %109, %156 : vector<16x128xf32>
    %178 = arith.mulf %126, %152 : vector<16x128xf32>
    %179 = arith.addf %177, %178 : vector<16x128xf32>
    %180 = arith.mulf %143, %148 : vector<16x128xf32>
    %181 = arith.addf %179, %180 : vector<16x128xf32>
    %182 = arith.mulf %109, %160 : vector<16x128xf32>
    %183 = arith.mulf %126, %156 : vector<16x128xf32>
    %184 = arith.addf %182, %183 : vector<16x128xf32>
    %185 = arith.mulf %143, %152 : vector<16x128xf32>
    %186 = arith.addf %184, %185 : vector<16x128xf32>
    %187 = arith.mulf %144, %148 : vector<16x128xf32>
    %188 = arith.addf %186, %187 : vector<16x128xf32>
    %189 = arith.mulf %109, %164 : vector<16x128xf32>
    %190 = arith.mulf %126, %160 : vector<16x128xf32>
    %191 = arith.addf %189, %190 : vector<16x128xf32>
    %192 = arith.mulf %143, %156 : vector<16x128xf32>
    %193 = arith.addf %191, %192 : vector<16x128xf32>
    %194 = arith.mulf %144, %152 : vector<16x128xf32>
    %195 = arith.addf %193, %194 : vector<16x128xf32>
    %196 = arith.mulf %109, %168 : vector<16x128xf32>
    %197 = arith.mulf %126, %164 : vector<16x128xf32>
    %198 = arith.addf %196, %197 : vector<16x128xf32>
    %199 = arith.mulf %143, %160 : vector<16x128xf32>
    %200 = arith.addf %198, %199 : vector<16x128xf32>
    %201 = arith.mulf %144, %156 : vector<16x128xf32>
    %202 = arith.addf %200, %201 : vector<16x128xf32>
    %203 = arith.mulf %109, %172 : vector<16x128xf32>
    %204 = arith.mulf %126, %168 : vector<16x128xf32>
    %205 = arith.addf %203, %204 : vector<16x128xf32>
    %206 = arith.mulf %143, %164 : vector<16x128xf32>
    %207 = arith.addf %205, %206 : vector<16x128xf32>
    %208 = arith.mulf %144, %160 : vector<16x128xf32>
    %209 = arith.addf %207, %208 : vector<16x128xf32>
    %210 = arith.mulf %126, %172 : vector<16x128xf32>
    %211 = arith.mulf %143, %168 : vector<16x128xf32>
    %212 = arith.addf %210, %211 : vector<16x128xf32>
    %213 = arith.mulf %144, %164 : vector<16x128xf32>
    %214 = arith.addf %212, %213 : vector<16x128xf32>
    %215 = arith.mulf %143, %172 : vector<16x128xf32>
    %216 = arith.mulf %144, %168 : vector<16x128xf32>
    %217 = arith.addf %215, %216 : vector<16x128xf32>
    %218 = arith.mulf %144, %172 : vector<16x128xf32>
    %219 = arith.truncf %7 : vector<16x128xf32> to vector<16x128xbf16>
    %c0_56 = arith.constant 0 : index
    %c0_57 = arith.constant 0 : index
    %220 = vector.load %arg5[%c0_56, %c0_57] : memref<176x128xbf16, #tpu.memory_space<vmem>>, vector<16x128xbf16>
    tpu.vector_store %arg5[%c0_56, %c0_57], %219 {strides = array<i32>} : memref<176x128xbf16, #tpu.memory_space<vmem>>, vector<16x128xbf16>,
    %221 = arith.truncf %173 : vector<16x128xf32> to vector<16x128xbf16>
    %c16 = arith.constant 16 : index
    %c0_58 = arith.constant 0 : index
    %222 = vector.load %arg5[%c16, %c0_58] : memref<176x128xbf16, #tpu.memory_space<vmem>>, vector<16x128xbf16>
    tpu.vector_store %arg5[%c16, %c0_58], %221 {strides = array<i32>} : memref<176x128xbf16, #tpu.memory_space<vmem>>, vector<16x128xbf16>,
    %223 = arith.truncf %176 : vector<16x128xf32> to vector<16x128xbf16>
    %c32 = arith.constant 32 : index
    %c0_59 = arith.constant 0 : index
    %224 = vector.load %arg5[%c32, %c0_59] : memref<176x128xbf16, #tpu.memory_space<vmem>>, vector<16x128xbf16>
    tpu.vector_store %arg5[%c32, %c0_59], %223 {strides = array<i32>} : memref<176x128xbf16, #tpu.memory_space<vmem>>, vector<16x128xbf16>,
    %225 = arith.truncf %181 : vector<16x128xf32> to vector<16x128xbf16>
    %c48 = arith.constant 48 : index
    %c0_60 = arith.constant 0 : index
    %226 = vector.load %arg5[%c48, %c0_60] : memref<176x128xbf16, #tpu.memory_space<vmem>>, vector<16x128xbf16>
    tpu.vector_store %arg5[%c48, %c0_60], %225 {strides = array<i32>} : memref<176x128xbf16, #tpu.memory_space<vmem>>, vector<16x128xbf16>,
    %227 = arith.truncf %188 : vector<16x128xf32> to vector<16x128xbf16>
    %c64 = arith.constant 64 : index
    %c0_61 = arith.constant 0 : index
    %228 = vector.load %arg5[%c64, %c0_61] : memref<176x128xbf16, #tpu.memory_space<vmem>>, vector<16x128xbf16>
    tpu.vector_store %arg5[%c64, %c0_61], %227 {strides = array<i32>} : memref<176x128xbf16, #tpu.memory_space<vmem>>, vector<16x128xbf16>,
    %229 = arith.truncf %195 : vector<16x128xf32> to vector<16x128xbf16>
    %c80 = arith.constant 80 : index
    %c0_62 = arith.constant 0 : index
    %230 = vector.load %arg5[%c80, %c0_62] : memref<176x128xbf16, #tpu.memory_space<vmem>>, vector<16x128xbf16>
    tpu.vector_store %arg5[%c80, %c0_62], %229 {strides = array<i32>} : memref<176x128xbf16, #tpu.memory_space<vmem>>, vector<16x128xbf16>,
    %231 = arith.truncf %202 : vector<16x128xf32> to vector<16x128xbf16>
    %c96 = arith.constant 96 : index
    %c0_63 = arith.constant 0 : index
    %232 = vector.load %arg5[%c96, %c0_63] : memref<176x128xbf16, #tpu.memory_space<vmem>>, vector<16x128xbf16>
    tpu.vector_store %arg5[%c96, %c0_63], %231 {strides = array<i32>} : memref<176x128xbf16, #tpu.memory_space<vmem>>, vector<16x128xbf16>,
    %233 = arith.truncf %209 : vector<16x128xf32> to vector<16x128xbf16>
    %c112 = arith.constant 112 : index
    %c0_64 = arith.constant 0 : index
    %234 = vector.load %arg5[%c112, %c0_64] : memref<176x128xbf16, #tpu.memory_space<vmem>>, vector<16x128xbf16>
    tpu.vector_store %arg5[%c112, %c0_64], %233 {strides = array<i32>} : memref<176x128xbf16, #tpu.memory_space<vmem>>, vector<16x128xbf16>,
    %235 = arith.truncf %214 : vector<16x128xf32> to vector<16x128xbf16>
    %c128 = arith.constant 128 : index
    %c0_65 = arith.constant 0 : index
    %236 = vector.load %arg5[%c128, %c0_65] : memref<176x128xbf16, #tpu.memory_space<vmem>>, vector<16x128xbf16>
    tpu.vector_store %arg5[%c128, %c0_65], %235 {strides = array<i32>} : memref<176x128xbf16, #tpu.memory_space<vmem>>, vector<16x128xbf16>,
    %237 = arith.truncf %217 : vector<16x128xf32> to vector<16x128xbf16>
    %c144 = arith.constant 144 : index
    %c0_66 = arith.constant 0 : index
    %238 = vector.load %arg5[%c144, %c0_66] : memref<176x128xbf16, #tpu.memory_space<vmem>>, vector<16x128xbf16>
    tpu.vector_store %arg5[%c144, %c0_66], %237 {strides = array<i32>} : memref<176x128xbf16, #tpu.memory_space<vmem>>, vector<16x128xbf16>,
    %239 = arith.truncf %218 : vector<16x128xf32> to vector<16x128xbf16>
    %c160 = arith.constant 160 : index
    %c0_67 = arith.constant 0 : index
    %240 = vector.load %arg5[%c160, %c0_67] : memref<176x128xbf16, #tpu.memory_space<vmem>>, vector<16x128xbf16>
    tpu.vector_store %arg5[%c160, %c0_67], %239 {strides = array<i32>} : memref<176x128xbf16, #tpu.memory_space<vmem>>, vector<16x128xbf16>,
    %c0_68 = arith.constant 0 : index
    %c0_69 = arith.constant 0 : index
    %241 = vector.load %arg2[%c0_68, %c0_69] : memref<32x176xbf16, #tpu.memory_space<vmem>>, vector<32x176xbf16>
    %c0_70 = arith.constant 0 : index
    %c0_71 = arith.constant 0 : index
    %242 = vector.load %arg5[%c0_70, %c0_71] : memref<176x128xbf16, #tpu.memory_space<vmem>>, vector<176x128xbf16>
    %cst_72 = arith.constant dense<0.000000e+00> : vector<32x128xf32>
    %243 = tpu.matmul %241, %242, %cst_72 {dimension_numbers = #tpu.dot_dimension_numbers<[1], [0], [0], [1], [0, 0, 1, 1], [], []>} : vector<32x176xbf16>, vector<176x128xbf16>, vector<32x128xf32> -> vector<32x128xf32>
    %cst_73 = arith.constant 0.000000e+00 : f32
    %244 = vector.broadcast %cst_73 : f32 to vector<32x128xf32>
    %245 = arith.subf %244, %243 : vector<32x128xf32>
    %246 = math.exp %245 : vector<32x128xf32>
    %cst_74 = arith.constant 1.000000e+00 : f32
    %247 = vector.broadcast %cst_74 : f32 to vector<32x128xf32>
    %248 = arith.addf %247, %246 : vector<32x128xf32>
    %249 = tpu.reciprocal %248 {approx = true} : vector<32x128xf32> -> vector<32x128xf32>
    %250 = arith.mulf %243, %249 : vector<32x128xf32>
    %cst_75 = arith.constant 3.000000e+00 : f32
    %251 = vector.broadcast %cst_75 : f32 to vector<32x128xf32>
    %cst_76 = arith.constant 0.307692319 : f32
    %252 = vector.broadcast %cst_76 : f32 to vector<32x128xf32>
    %253 = arith.cmpf oge, %243, %252 : vector<32x128xf32>
    %254 = arith.extui %253 : vector<32x128xi1> to vector<32x128xi32>
    %255 = arith.sitofp %254 : vector<32x128xi32> to vector<32x128xf32>
    %256 = arith.addf %251, %255 : vector<32x128xf32>
    %cst_77 = arith.constant 0.384615391 : f32
    %257 = vector.broadcast %cst_77 : f32 to vector<32x128xf32>
    %258 = arith.cmpf oge, %243, %257 : vector<32x128xf32>
    %259 = arith.extui %258 : vector<32x128xi1> to vector<32x128xi32>
    %260 = arith.sitofp %259 : vector<32x128xi32> to vector<32x128xf32>
    %261 = arith.addf %256, %260 : vector<32x128xf32>
    %cst_78 = arith.constant 0.461538464 : f32
    %262 = vector.broadcast %cst_78 : f32 to vector<32x128xf32>
    %263 = arith.cmpf oge, %243, %262 : vector<32x128xf32>
    %264 = arith.extui %263 : vector<32x128xi1> to vector<32x128xi32>
    %265 = arith.sitofp %264 : vector<32x128xi32> to vector<32x128xf32>
    %266 = arith.addf %261, %265 : vector<32x128xf32>
    %cst_79 = arith.constant 0.538461566 : f32
    %267 = vector.broadcast %cst_79 : f32 to vector<32x128xf32>
    %268 = arith.cmpf oge, %243, %267 : vector<32x128xf32>
    %269 = arith.extui %268 : vector<32x128xi1> to vector<32x128xi32>
    %270 = arith.sitofp %269 : vector<32x128xi32> to vector<32x128xf32>
    %271 = arith.addf %266, %270 : vector<32x128xf32>
    %cst_80 = arith.constant 0.615384638 : f32
    %272 = vector.broadcast %cst_80 : f32 to vector<32x128xf32>
    %273 = arith.cmpf oge, %243, %272 : vector<32x128xf32>
    %274 = arith.extui %273 : vector<32x128xi1> to vector<32x128xi32>
    %275 = arith.sitofp %274 : vector<32x128xi32> to vector<32x128xf32>
    %276 = arith.addf %271, %275 : vector<32x128xf32>
    %cst_81 = arith.constant 0.692307711 : f32
    %277 = vector.broadcast %cst_81 : f32 to vector<32x128xf32>
    %278 = arith.cmpf oge, %243, %277 : vector<32x128xf32>
    %279 = arith.extui %278 : vector<32x128xi1> to vector<32x128xi32>
    %280 = arith.sitofp %279 : vector<32x128xi32> to vector<32x128xf32>
    %281 = arith.addf %276, %280 : vector<32x128xf32>
    %cst_82 = arith.constant 1.000000e+00 : f32
    %282 = vector.broadcast %cst_82 : f32 to vector<32x128xf32>
    %cst_83 = arith.constant 0.000000e+00 : f32
    %283 = vector.broadcast %cst_83 : f32 to vector<32x128xf32>
    %cst_84 = arith.constant 1.000000e+00 : f32
    %284 = vector.broadcast %cst_84 : f32 to vector<32x128xf32>
    %285 = arith.addf %281, %284 : vector<32x128xf32>
    %cst_85 = arith.constant 1.300000e+01 : f32
    %286 = vector.broadcast %cst_85 : f32 to vector<32x128xf32>
    %287 = arith.divf %285, %286 : vector<32x128xf32>
    %288 = arith.subf %287, %243 : vector<32x128xf32>
    %cst_86 = arith.constant 1.000000e+00 : f32
    %289 = vector.broadcast %cst_86 : f32 to vector<32x128xf32>
    %290 = arith.addf %281, %289 : vector<32x128xf32>
    %cst_87 = arith.constant 1.000000e+00 : f32
    %291 = vector.broadcast %cst_87 : f32 to vector<32x128xf32>
    %292 = arith.subf %290, %291 : vector<32x128xf32>
    %cst_88 = arith.constant 1.300000e+01 : f32
    %293 = vector.broadcast %cst_88 : f32 to vector<32x128xf32>
    %294 = arith.divf %292, %293 : vector<32x128xf32>
    %295 = arith.subf %243, %294 : vector<32x128xf32>
    %cst_89 = arith.constant 1.300000e+01 : f32
    %296 = vector.broadcast %cst_89 : f32 to vector<32x128xf32>
    %297 = arith.mulf %282, %296 : vector<32x128xf32>
    %298 = arith.mulf %288, %297 : vector<32x128xf32>
    %299 = arith.addf %283, %298 : vector<32x128xf32>
    %300 = arith.mulf %295, %297 : vector<32x128xf32>
    %cst_90 = arith.constant 0.000000e+00 : f32
    %301 = vector.broadcast %cst_90 : f32 to vector<32x128xf32>
    %cst_91 = arith.constant 1.000000e+00 : f32
    %302 = vector.broadcast %cst_91 : f32 to vector<32x128xf32>
    %303 = arith.addf %281, %302 : vector<32x128xf32>
    %cst_92 = arith.constant 1.300000e+01 : f32
    %304 = vector.broadcast %cst_92 : f32 to vector<32x128xf32>
    %305 = arith.divf %303, %304 : vector<32x128xf32>
    %306 = arith.subf %305, %243 : vector<32x128xf32>
    %cst_93 = arith.constant 1.000000e+00 : f32
    %307 = vector.broadcast %cst_93 : f32 to vector<32x128xf32>
    %308 = arith.addf %281, %307 : vector<32x128xf32>
    %cst_94 = arith.constant 2.000000e+00 : f32
    %309 = vector.broadcast %cst_94 : f32 to vector<32x128xf32>
    %310 = arith.subf %308, %309 : vector<32x128xf32>
    %cst_95 = arith.constant 1.300000e+01 : f32
    %311 = vector.broadcast %cst_95 : f32 to vector<32x128xf32>
    %312 = arith.divf %310, %311 : vector<32x128xf32>
    %313 = arith.subf %243, %312 : vector<32x128xf32>
    %cst_96 = arith.constant 6.500000e+00 : f32
    %314 = vector.broadcast %cst_96 : f32 to vector<32x128xf32>
    %315 = arith.mulf %299, %314 : vector<32x128xf32>
    %316 = arith.mulf %306, %315 : vector<32x128xf32>
    %317 = arith.addf %301, %316 : vector<32x128xf32>
    %318 = arith.mulf %313, %315 : vector<32x128xf32>
    %cst_97 = arith.constant 2.000000e+00 : f32
    %319 = vector.broadcast %cst_97 : f32 to vector<32x128xf32>
    %320 = arith.addf %281, %319 : vector<32x128xf32>
    %cst_98 = arith.constant 1.300000e+01 : f32
    %321 = vector.broadcast %cst_98 : f32 to vector<32x128xf32>
    %322 = arith.divf %320, %321 : vector<32x128xf32>
    %323 = arith.subf %322, %243 : vector<32x128xf32>
    %cst_99 = arith.constant 1.000000e+00 : f32
    %324 = vector.broadcast %cst_99 : f32 to vector<32x128xf32>
    %325 = arith.addf %281, %324 : vector<32x128xf32>
    %cst_100 = arith.constant 1.000000e+00 : f32
    %326 = vector.broadcast %cst_100 : f32 to vector<32x128xf32>
    %327 = arith.subf %325, %326 : vector<32x128xf32>
    %cst_101 = arith.constant 1.300000e+01 : f32
    %328 = vector.broadcast %cst_101 : f32 to vector<32x128xf32>
    %329 = arith.divf %327, %328 : vector<32x128xf32>
    %330 = arith.subf %243, %329 : vector<32x128xf32>
    %cst_102 = arith.constant 6.500000e+00 : f32
    %331 = vector.broadcast %cst_102 : f32 to vector<32x128xf32>
    %332 = arith.mulf %300, %331 : vector<32x128xf32>
    %333 = arith.mulf %323, %332 : vector<32x128xf32>
    %334 = arith.addf %318, %333 : vector<32x128xf32>
    %335 = arith.mulf %330, %332 : vector<32x128xf32>
    %cst_103 = arith.constant 0.000000e+00 : f32
    %336 = vector.broadcast %cst_103 : f32 to vector<32x128xf32>
    %cst_104 = arith.constant 1.000000e+00 : f32
    %337 = vector.broadcast %cst_104 : f32 to vector<32x128xf32>
    %338 = arith.addf %281, %337 : vector<32x128xf32>
    %cst_105 = arith.constant 1.300000e+01 : f32
    %339 = vector.broadcast %cst_105 : f32 to vector<32x128xf32>
    %340 = arith.divf %338, %339 : vector<32x128xf32>
    %341 = arith.subf %340, %243 : vector<32x128xf32>
    %cst_106 = arith.constant 1.000000e+00 : f32
    %342 = vector.broadcast %cst_106 : f32 to vector<32x128xf32>
    %343 = arith.addf %281, %342 : vector<32x128xf32>
    %cst_107 = arith.constant 3.000000e+00 : f32
    %344 = vector.broadcast %cst_107 : f32 to vector<32x128xf32>
    %345 = arith.subf %343, %344 : vector<32x128xf32>
    %cst_108 = arith.constant 1.300000e+01 : f32
    %346 = vector.broadcast %cst_108 : f32 to vector<32x128xf32>
    %347 = arith.divf %345, %346 : vector<32x128xf32>
    %348 = arith.subf %243, %347 : vector<32x128xf32>
    %cst_109 = arith.constant 4.33333349 : f32
    %349 = vector.broadcast %cst_109 : f32 to vector<32x128xf32>
    %350 = arith.mulf %317, %349 : vector<32x128xf32>
    %351 = arith.mulf %341, %350 : vector<32x128xf32>
    %352 = arith.addf %336, %351 : vector<32x128xf32>
    %353 = arith.mulf %348, %350 : vector<32x128xf32>
    %cst_110 = arith.constant 2.000000e+00 : f32
    %354 = vector.broadcast %cst_110 : f32 to vector<32x128xf32>
    %355 = arith.addf %281, %354 : vector<32x128xf32>
    %cst_111 = arith.constant 1.300000e+01 : f32
    %356 = vector.broadcast %cst_111 : f32 to vector<32x128xf32>
    %357 = arith.divf %355, %356 : vector<32x128xf32>
    %358 = arith.subf %357, %243 : vector<32x128xf32>
    %cst_112 = arith.constant 1.000000e+00 : f32
    %359 = vector.broadcast %cst_112 : f32 to vector<32x128xf32>
    %360 = arith.addf %281, %359 : vector<32x128xf32>
    %cst_113 = arith.constant 2.000000e+00 : f32
    %361 = vector.broadcast %cst_113 : f32 to vector<32x128xf32>
    %362 = arith.subf %360, %361 : vector<32x128xf32>
    %cst_114 = arith.constant 1.300000e+01 : f32
    %363 = vector.broadcast %cst_114 : f32 to vector<32x128xf32>
    %364 = arith.divf %362, %363 : vector<32x128xf32>
    %365 = arith.subf %243, %364 : vector<32x128xf32>
    %cst_115 = arith.constant 4.33333349 : f32
    %366 = vector.broadcast %cst_115 : f32 to vector<32x128xf32>
    %367 = arith.mulf %334, %366 : vector<32x128xf32>
    %368 = arith.mulf %358, %367 : vector<32x128xf32>
    %369 = arith.addf %353, %368 : vector<32x128xf32>
    %370 = arith.mulf %365, %367 : vector<32x128xf32>
    %cst_116 = arith.constant 3.000000e+00 : f32
    %371 = vector.broadcast %cst_116 : f32 to vector<32x128xf32>
    %372 = arith.addf %281, %371 : vector<32x128xf32>
    %cst_117 = arith.constant 1.300000e+01 : f32
    %373 = vector.broadcast %cst_117 : f32 to vector<32x128xf32>
    %374 = arith.divf %372, %373 : vector<32x128xf32>
    %375 = arith.subf %374, %243 : vector<32x128xf32>
    %cst_118 = arith.constant 1.000000e+00 : f32
    %376 = vector.broadcast %cst_118 : f32 to vector<32x128xf32>
    %377 = arith.addf %281, %376 : vector<32x128xf32>
    %cst_119 = arith.constant 1.000000e+00 : f32
    %378 = vector.broadcast %cst_119 : f32 to vector<32x128xf32>
    %379 = arith.subf %377, %378 : vector<32x128xf32>
    %cst_120 = arith.constant 1.300000e+01 : f32
    %380 = vector.broadcast %cst_120 : f32 to vector<32x128xf32>
    %381 = arith.divf %379, %380 : vector<32x128xf32>
    %382 = arith.subf %243, %381 : vector<32x128xf32>
    %cst_121 = arith.constant 4.33333349 : f32
    %383 = vector.broadcast %cst_121 : f32 to vector<32x128xf32>
    %384 = arith.mulf %335, %383 : vector<32x128xf32>
    %385 = arith.mulf %375, %384 : vector<32x128xf32>
    %386 = arith.addf %370, %385 : vector<32x128xf32>
    %387 = arith.mulf %382, %384 : vector<32x128xf32>
    %cst_122 = arith.constant 3.000000e+00 : f32
    %388 = vector.broadcast %cst_122 : f32 to vector<32x128xf32>
    %389 = arith.cmpf oeq, %281, %388 : vector<32x128xf32>
    %390 = arith.extui %389 : vector<32x128xi1> to vector<32x128xi32>
    %391 = arith.sitofp %390 : vector<32x128xi32> to vector<32x128xf32>
    %cst_123 = arith.constant 4.000000e+00 : f32
    %392 = vector.broadcast %cst_123 : f32 to vector<32x128xf32>
    %393 = arith.cmpf oeq, %281, %392 : vector<32x128xf32>
    %394 = arith.extui %393 : vector<32x128xi1> to vector<32x128xi32>
    %395 = arith.sitofp %394 : vector<32x128xi32> to vector<32x128xf32>
    %cst_124 = arith.constant 5.000000e+00 : f32
    %396 = vector.broadcast %cst_124 : f32 to vector<32x128xf32>
    %397 = arith.cmpf oeq, %281, %396 : vector<32x128xf32>
    %398 = arith.extui %397 : vector<32x128xi1> to vector<32x128xi32>
    %399 = arith.sitofp %398 : vector<32x128xi32> to vector<32x128xf32>
    %cst_125 = arith.constant 6.000000e+00 : f32
    %400 = vector.broadcast %cst_125 : f32 to vector<32x128xf32>
    %401 = arith.cmpf oeq, %281, %400 : vector<32x128xf32>
    %402 = arith.extui %401 : vector<32x128xi1> to vector<32x128xi32>
    %403 = arith.sitofp %402 : vector<32x128xi32> to vector<32x128xf32>
    %cst_126 = arith.constant 7.000000e+00 : f32
    %404 = vector.broadcast %cst_126 : f32 to vector<32x128xf32>
    %405 = arith.cmpf oeq, %281, %404 : vector<32x128xf32>
    %406 = arith.extui %405 : vector<32x128xi1> to vector<32x128xi32>
    %407 = arith.sitofp %406 : vector<32x128xi32> to vector<32x128xf32>
    %cst_127 = arith.constant 8.000000e+00 : f32
    %408 = vector.broadcast %cst_127 : f32 to vector<32x128xf32>
    %409 = arith.cmpf oeq, %281, %408 : vector<32x128xf32>
    %410 = arith.extui %409 : vector<32x128xi1> to vector<32x128xi32>
    %411 = arith.sitofp %410 : vector<32x128xi32> to vector<32x128xf32>
    %cst_128 = arith.constant 9.000000e+00 : f32
    %412 = vector.broadcast %cst_128 : f32 to vector<32x128xf32>
    %413 = arith.cmpf oeq, %281, %412 : vector<32x128xf32>
    %414 = arith.extui %413 : vector<32x128xi1> to vector<32x128xi32>
    %415 = arith.sitofp %414 : vector<32x128xi32> to vector<32x128xf32>
    %416 = arith.mulf %352, %391 : vector<32x128xf32>
    %417 = arith.mulf %352, %395 : vector<32x128xf32>
    %418 = arith.mulf %369, %391 : vector<32x128xf32>
    %419 = arith.addf %417, %418 : vector<32x128xf32>
    %420 = arith.mulf %352, %399 : vector<32x128xf32>
    %421 = arith.mulf %369, %395 : vector<32x128xf32>
    %422 = arith.addf %420, %421 : vector<32x128xf32>
    %423 = arith.mulf %386, %391 : vector<32x128xf32>
    %424 = arith.addf %422, %423 : vector<32x128xf32>
    %425 = arith.mulf %352, %403 : vector<32x128xf32>
    %426 = arith.mulf %369, %399 : vector<32x128xf32>
    %427 = arith.addf %425, %426 : vector<32x128xf32>
    %428 = arith.mulf %386, %395 : vector<32x128xf32>
    %429 = arith.addf %427, %428 : vector<32x128xf32>
    %430 = arith.mulf %387, %391 : vector<32x128xf32>
    %431 = arith.addf %429, %430 : vector<32x128xf32>
    %432 = arith.mulf %352, %407 : vector<32x128xf32>
    %433 = arith.mulf %369, %403 : vector<32x128xf32>
    %434 = arith.addf %432, %433 : vector<32x128xf32>
    %435 = arith.mulf %386, %399 : vector<32x128xf32>
    %436 = arith.addf %434, %435 : vector<32x128xf32>
    %437 = arith.mulf %387, %395 : vector<32x128xf32>
    %438 = arith.addf %436, %437 : vector<32x128xf32>
    %439 = arith.mulf %352, %411 : vector<32x128xf32>
    %440 = arith.mulf %369, %407 : vector<32x128xf32>
    %441 = arith.addf %439, %440 : vector<32x128xf32>
    %442 = arith.mulf %386, %403 : vector<32x128xf32>
    %443 = arith.addf %441, %442 : vector<32x128xf32>
    %444 = arith.mulf %387, %399 : vector<32x128xf32>
    %445 = arith.addf %443, %444 : vector<32x128xf32>
    %446 = arith.mulf %352, %415 : vector<32x128xf32>
    %447 = arith.mulf %369, %411 : vector<32x128xf32>
    %448 = arith.addf %446, %447 : vector<32x128xf32>
    %449 = arith.mulf %386, %407 : vector<32x128xf32>
    %450 = arith.addf %448, %449 : vector<32x128xf32>
    %451 = arith.mulf %387, %403 : vector<32x128xf32>
    %452 = arith.addf %450, %451 : vector<32x128xf32>
    %453 = arith.mulf %369, %415 : vector<32x128xf32>
    %454 = arith.mulf %386, %411 : vector<32x128xf32>
    %455 = arith.addf %453, %454 : vector<32x128xf32>
    %456 = arith.mulf %387, %407 : vector<32x128xf32>
    %457 = arith.addf %455, %456 : vector<32x128xf32>
    %458 = arith.mulf %386, %415 : vector<32x128xf32>
    %459 = arith.mulf %387, %411 : vector<32x128xf32>
    %460 = arith.addf %458, %459 : vector<32x128xf32>
    %461 = arith.mulf %387, %415 : vector<32x128xf32>
    %462 = arith.truncf %250 : vector<32x128xf32> to vector<32x128xbf16>
    %c0_129 = arith.constant 0 : index
    %c0_130 = arith.constant 0 : index
    %463 = vector.load %arg6[%c0_129, %c0_130] : memref<352x128xbf16, #tpu.memory_space<vmem>>, vector<32x128xbf16>
    tpu.vector_store %arg6[%c0_129, %c0_130], %462 {strides = array<i32>} : memref<352x128xbf16, #tpu.memory_space<vmem>>, vector<32x128xbf16>,
    %464 = arith.truncf %416 : vector<32x128xf32> to vector<32x128xbf16>
    %c32_131 = arith.constant 32 : index
    %c0_132 = arith.constant 0 : index
    %465 = vector.load %arg6[%c32_131, %c0_132] : memref<352x128xbf16, #tpu.memory_space<vmem>>, vector<32x128xbf16>
    tpu.vector_store %arg6[%c32_131, %c0_132], %464 {strides = array<i32>} : memref<352x128xbf16, #tpu.memory_space<vmem>>, vector<32x128xbf16>,
    %466 = arith.truncf %419 : vector<32x128xf32> to vector<32x128xbf16>
    %c64_133 = arith.constant 64 : index
    %c0_134 = arith.constant 0 : index
    %467 = vector.load %arg6[%c64_133, %c0_134] : memref<352x128xbf16, #tpu.memory_space<vmem>>, vector<32x128xbf16>
    tpu.vector_store %arg6[%c64_133, %c0_134], %466 {strides = array<i32>} : memref<352x128xbf16, #tpu.memory_space<vmem>>, vector<32x128xbf16>,
    %468 = arith.truncf %424 : vector<32x128xf32> to vector<32x128xbf16>
    %c96_135 = arith.constant 96 : index
    %c0_136 = arith.constant 0 : index
    %469 = vector.load %arg6[%c96_135, %c0_136] : memref<352x128xbf16, #tpu.memory_space<vmem>>, vector<32x128xbf16>
    tpu.vector_store %arg6[%c96_135, %c0_136], %468 {strides = array<i32>} : memref<352x128xbf16, #tpu.memory_space<vmem>>, vector<32x128xbf16>,
    %470 = arith.truncf %431 : vector<32x128xf32> to vector<32x128xbf16>
    %c128_137 = arith.constant 128 : index
    %c0_138 = arith.constant 0 : index
    %471 = vector.load %arg6[%c128_137, %c0_138] : memref<352x128xbf16, #tpu.memory_space<vmem>>, vector<32x128xbf16>
    tpu.vector_store %arg6[%c128_137, %c0_138], %470 {strides = array<i32>} : memref<352x128xbf16, #tpu.memory_space<vmem>>, vector<32x128xbf16>,
    %472 = arith.truncf %438 : vector<32x128xf32> to vector<32x128xbf16>
    %c160_139 = arith.constant 160 : index
    %c0_140 = arith.constant 0 : index
    %473 = vector.load %arg6[%c160_139, %c0_140] : memref<352x128xbf16, #tpu.memory_space<vmem>>, vector<32x128xbf16>
    tpu.vector_store %arg6[%c160_139, %c0_140], %472 {strides = array<i32>} : memref<352x128xbf16, #tpu.memory_space<vmem>>, vector<32x128xbf16>,
    %474 = arith.truncf %445 : vector<32x128xf32> to vector<32x128xbf16>
    %c192 = arith.constant 192 : index
    %c0_141 = arith.constant 0 : index
    %475 = vector.load %arg6[%c192, %c0_141] : memref<352x128xbf16, #tpu.memory_space<vmem>>, vector<32x128xbf16>
    tpu.vector_store %arg6[%c192, %c0_141], %474 {strides = array<i32>} : memref<352x128xbf16, #tpu.memory_space<vmem>>, vector<32x128xbf16>,
    %476 = arith.truncf %452 : vector<32x128xf32> to vector<32x128xbf16>
    %c224 = arith.constant 224 : index
    %c0_142 = arith.constant 0 : index
    %477 = vector.load %arg6[%c224, %c0_142] : memref<352x128xbf16, #tpu.memory_space<vmem>>, vector<32x128xbf16>
    tpu.vector_store %arg6[%c224, %c0_142], %476 {strides = array<i32>} : memref<352x128xbf16, #tpu.memory_space<vmem>>, vector<32x128xbf16>,
    %478 = arith.truncf %457 : vector<32x128xf32> to vector<32x128xbf16>
    %c256 = arith.constant 256 : index
    %c0_143 = arith.constant 0 : index
    %479 = vector.load %arg6[%c256, %c0_143] : memref<352x128xbf16, #tpu.memory_space<vmem>>, vector<32x128xbf16>
    tpu.vector_store %arg6[%c256, %c0_143], %478 {strides = array<i32>} : memref<352x128xbf16, #tpu.memory_space<vmem>>, vector<32x128xbf16>,
    %480 = arith.truncf %460 : vector<32x128xf32> to vector<32x128xbf16>
    %c288 = arith.constant 288 : index
    %c0_144 = arith.constant 0 : index
    %481 = vector.load %arg6[%c288, %c0_144] : memref<352x128xbf16, #tpu.memory_space<vmem>>, vector<32x128xbf16>
    tpu.vector_store %arg6[%c288, %c0_144], %480 {strides = array<i32>} : memref<352x128xbf16, #tpu.memory_space<vmem>>, vector<32x128xbf16>,
    %482 = arith.truncf %461 : vector<32x128xf32> to vector<32x128xbf16>
    %c320 = arith.constant 320 : index
    %c0_145 = arith.constant 0 : index
    %483 = vector.load %arg6[%c320, %c0_145] : memref<352x128xbf16, #tpu.memory_space<vmem>>, vector<32x128xbf16>
    tpu.vector_store %arg6[%c320, %c0_145], %482 {strides = array<i32>} : memref<352x128xbf16, #tpu.memory_space<vmem>>, vector<32x128xbf16>,
    %c0_146 = arith.constant 0 : index
    %c0_147 = arith.constant 0 : index
    %484 = vector.load %arg3[%c0_146, %c0_147] : memref<8x352xbf16, #tpu.memory_space<vmem>>, vector<8x352xbf16>
    %c0_148 = arith.constant 0 : index
    %c0_149 = arith.constant 0 : index
    %485 = vector.load %arg6[%c0_148, %c0_149] : memref<352x128xbf16, #tpu.memory_space<vmem>>, vector<352x128xbf16>
    %cst_150 = arith.constant dense<0.000000e+00> : vector<8x128xf32>
    %486 = tpu.matmul %484, %485, %cst_150 {dimension_numbers = #tpu.dot_dimension_numbers<[1], [0], [0], [1], [0, 0, 1, 1], [], []>} : vector<8x352xbf16>, vector<352x128xbf16>, vector<8x128xf32> -> vector<8x128xf32>
    %c0_151 = arith.constant 0 : index
    %c0_152 = arith.constant 0 : index
    %487 = vector.load %arg4[%c0_151, %c0_152] : memref<8x128xf32, #tpu.memory_space<vmem>>, vector<8x128xf32>
    tpu.vector_store %arg4[%c0_151, %c0_152], %486 {strides = array<i32>} : memref<8x128xf32, #tpu.memory_space<vmem>>, vector<8x128xf32>,
    return
  }
  func.func @transform_0(%arg0: i32) -> (i32, i32) {
    %c0_i32 = arith.constant 0 : i32
    %c0_i32_0 = arith.constant 0 : i32
    return %c0_i32, %arg0 : i32, i32
  }
  func.func @transform_1(%arg0: i32) -> (i32, i32) {
    %c0_i32 = arith.constant 0 : i32
    %c0_i32_0 = arith.constant 0 : i32
    %c0_i32_1 = arith.constant 0 : i32
    return %c0_i32, %c0_i32_0 : i32, i32
  }
  func.func @transform_2(%arg0: i32) -> (i32, i32) {
    %c0_i32 = arith.constant 0 : i32
    %c0_i32_0 = arith.constant 0 : i32
    %c0_i32_1 = arith.constant 0 : i32
    return %c0_i32, %c0_i32_0 : i32, i32
  }
  func.func @transform_3(%arg0: i32) -> (i32, i32) {
    %c0_i32 = arith.constant 0 : i32
    %c0_i32_0 = arith.constant 0 : i32
    return %c0_i32, %arg0 : i32, i32
  }
}

</mosaic_0001>

<bundles_post_ra>
// kernel: tpu_custom_call.1
= control target key start
LH: loop header
LB: loop body
LE: loop exit
PB: predicated region body
PF: predicated region fallthrough
CT: control target
= control target key end

     0   :  { %8 = vsyncpa [#allocation5], 0  ;;  %s2917_s0 = inlined_call_operand.hbm [shape: f32[16,256], index: 0, kind: input, shape index: {}]   ;;  %s2918_s1 = inlined_call_operand.hbm [shape: bf16[32,176], index: 1, kind: input, shape index: {}]   ;;  %s2919_s2 = inlined_call_operand.hbm [shape: bf16[8,352], index: 2, kind: input, shape index: {}]   ;;  %s2920_s3 = inlined_call_operand.hbm [shape: f32[8,256], index: 3, kind: output, shape index: {}]  }
   0x1   :  { %10 = vsyncpa [#allocation5 + $0x1], 0 }
   0x2   :  { %11 = vsyncpa [#allocation8], 0 }
   0x3   :  { %12 = vsyncpa [#allocation6], 0 }
   0x4   :  { %14 = vsyncpa [#allocation6 + $0x1], 0  ;;  %s1885_s12 = smov 0   ;;  %s1887_s13 = smov 0  }
   0x5   :  { %s1889_s14 = smov 0   ;;  %s1891_s15 = smov 0  }
   0x6 LB: > { %s1906_s16 = sadd.s32 4294967295, %s1853_s15   ;;  %s1424_s17 = sadd.s32 4294967294, %s1853_s15   ;;  %s1853_s15 = sphi %s1891_s15, %s3005_s15   ;;  %s1849_s14 = sphi %s1889_s14, %s3004_s14   ;;  %s1845_s13 = sphi %s1887_s13, %s3003_s13   ;;  %s1841_s12 = sphi %s1885_s12, %s3002_s12  }
   0x7   : > { %s1910_s18 = sadd.s32 1, %s1853_s15   ;;  %s27_s19 = sadd.s32 1, %s1849_s14 }
   0x8   : > { %s24_s20 = ssub.s32 %s1853_s15, %s1910_s18  ;;  %p34_p0 = scmp.ne.s32.totalorder %s1849_s14, %s1845_s13 }
   0x9   : > { %p25_p1 = scmp.eq.s32.totalorder %s24_s20, 0  ;;  %p35_p2 = scmp.eq.s32.totalorder %s1853_s15, 0 }
   0xa   : > { %p40_p3 = scmp.ne.s32.totalorder %s1845_s13, %s1841_s12  ;;  %p2921_p4 = scmp.eq.s32.totalorder %s1906_s16, 0 }
   0xb   : > { %s1922_s21 = scalar_select %p25_p1, %s1849_s14, %s27_s19  }
   0xc   : > { %p1924_p5 = por %p35_p2, %p34_p0  ;;  %p1930_p6 = por %p2921_p4, %p40_p3 }
   0xd   : > { %p106_p7 = scmp.eq.s32.totalorder %s1906_s16, 1  ;;  %p112_p8 = scmp.eq.s32.totalorder %s1424_s17, 1 }
   0xe   : > { %s2946_s22 = scalar_select %p1924_p5, 1, 0 }
   0xf   : > { %s2947_s23 = scalar_select %p1930_p6, 1, 0 }
  0x10   : > { %p1425_p9 = scmp.ge.s32.totalorder %s1853_s15, 1  ;;  %p119_p10 = scmp.lt.s32.totalorder %s1853_s15, 3 }
  0x11   : > { %p1937_p11 = por %p106_p7, %p34_p0  ;;  %p1941_p12 = por %p112_p8, %p40_p3 }
  0x12   : > { %p1945_p13 = pnand %p1425_p9, %p119_p10  ;;  %s1855_s27 = smov [#allocation7]  }
  0x13   : > { %s2948_s24 = scalar_select %p1937_p11, 1, 0 }
  0x14   : > { %s2949_s25 = scalar_select %p1941_p12, 1, 0 }
  0x15   : > { %s2950_s26 = scalar_select %p1945_p13, 1, 0 }
  0x16   : > { %p1603_p1 = pneg %p1945_p13  ;;  %s131_s28 = sshll.u32 %s1855_s27, 4  ;;  %s132_s28 = int_to_ptr.vmem [resolvable:$true] %s131_s28 }
  0x17   : > { %s1856_s30 = smov [#allocation9]   ;;  %s1697_s7 = scalar_lea.hbm %s2918_s1, 512 }
  0x18   : > { %p1953_p2 = pnand %p1603_p1, %p2921_p4  ;;  %s145_s4 = sshll.u32 %s1856_s30, 4  ;;  %s146_s4 = int_to_ptr.vmem [resolvable:$true] %s145_s4 }
  0x19   : > { %p1698_p7 = scmp.ne.s32.totalorder %s2918_s1, %s1697_s7  ;;  %p1704_p1 = scmp.lt.u32.totalorder %s1697_s7, %s2918_s1 }
  0x1a   : > { %p1699_p8 = pneg %p1953_p2 }
  0x1c   : > { %p1700_p9 = pnand %p1699_p8, %p1698_p7 }
  0x1e   : > { %p1701_p10 = pneg %p1700_p9 }
  0x20   : > { %p1706_p0 = pnand %p1704_p1, %p1701_p10 }
  0x22   : > { %1709 = shalt.err (!%p1706_p0)
}
  0x23   : > { %s1710_s17 = scalar_lea.vmem %s132_s28, 512  ;;  %p1718_p11 = scmp.lt.s32.totalorder %s132_s28, %s132_s28 }
  0x24   : > { %p1711_p4 = scmp.ne.s32.totalorder %s132_s28, %s1710_s17  ;;  %p1719_p6 = scmp.lt.s32.totalorder %s1710_s17, %s1710_s17 }
  0x26   : > { %p1713_p3 = pnand %p1711_p4, %p1699_p8  ;;  %p1720_p13 = por %p1719_p6, %p1718_p11 }
  0x28   : > { %p1714_p12 = pneg %p1713_p3 }
  0x2a   : > { %p1721_p5 = pnand %p1720_p13, %p1714_p12 }
  0x2c   : > { %1724 = shalt.err (!%p1721_p5)
}
  0x2d   : > { %s1857_s19 = smov 128   ;;  %s1858_s20 = smov 8  }
  0x2e   : > { %1606 = dma.hbm_to_vmem [thread:$0]  (!%p1953_p2), %s2918_s1, 512, %s132_s28, [#allocation8], %s1857_s19, %s1857_s19, %s1858_s20  }
  0x2f   : > { %p2952_p4 = scmp.ne.s32.totalorder %s2946_s22, 0  ;;  %p2953_p0 = scmp.lt.s32.totalorder %s1853_s15, 2 }
  0x30   : > { %s1725_s8 = scalar_lea.hbm %s2919_s2, 192 }
  0x31   : > { %p1988_p3 = pnand %p2953_p0, %p2952_p4  ;;  %p1726_p5 = scmp.ne.s32.totalorder %s2919_s2, %s1725_s8 }
  0x32   : > { %p1732_p12 = scmp.lt.u32.totalorder %s1725_s8, %s2919_s2 }
  0x33   : > { %s2954_s5 = scalar_select %p1988_p3, 1, 0 }
  0x34   : > { %p1728_p6 = pnand %p1726_p5, %p1699_p8 }
  0x36   : > { %p1729_p11 = pneg %p1728_p6 }
  0x38   : > { %p1734_p13 = pnand %p1732_p12, %p1729_p11 }
  0x3a   : > { %1737 = shalt.err (!%p1734_p13)
}
  0x3b   : > { %s1738_s11 = scalar_lea.vmem %s146_s4, 192  ;;  %p1746_p1 = scmp.lt.s32.totalorder %s146_s4, %s146_s4 }
  0x3c   : > { %p1739_p7 = scmp.ne.s32.totalorder %s146_s4, %s1738_s11  ;;  %p1747_p4 = scmp.lt.s32.totalorder %s1738_s11, %s1738_s11 }
  0x3e   : > { %p1741_p9 = pnand %p1739_p7, %p1699_p8  ;;  %p1748_p0 = por %p1747_p4, %p1746_p1 }
  0x40   : > { %p1742_p10 = pneg %p1741_p9 }
  0x42   : > { %p1749_p3 = pnand %p1748_p0, %p1742_p10 }
  0x44   : > { %1752 = shalt.err (!%p1749_p3)
}
  0x45   : > { %1609 = dma.hbm_to_vmem [thread:$0]  (!%p1953_p2), %s2919_s2, 192, %s146_s4, [#allocation8]  }
  0x46   : > { %s156_s30 = sand.u32 1, %s1849_s14   ;;  %s1430_s7 = sshll.u32 %s1853_s15, 7 }
  0x47   : > { %s1429_s6 = sshll.u32 %s156_s30, 4  ;;  %s2017_s10 = scalar_lea.hbm %s2917_s0, %s1430_s7 }
  0x48   : > { %s160_s29 = scalar_lea.vmem [#allocation4], %s1429_s6  ;;  %s2021_s22 = scalar_lea.sflag [#allocation5], %s156_s30 }
  0x49   : > { %s166_s28 = sshll.u32 %s160_s29, 4  ;;  %s1753_s11 = scalar_lea.hbm %s2017_s10, 256  ;;  %s2019_s28 = int_to_ptr.vmem [resolvable:$true] %s166_s28 }
  0x4a   : > { %p1754_p2 = scmp.ne.s32.totalorder %s2017_s10, %s1753_s11  ;;  %p2955_p8 = scmp.ne.s32.totalorder %s2954_s5, 0 }
  0x4b   : > { %s1758_s27 = scalar_lea.hbm %s2917_s0, 512  ;;  %p1759_p11 = scmp.lt.u32.totalorder %s2017_s10, %s2917_s0 }
  0x4c   : > { %p1755_p3 = pneg %p2955_p8  ;;  %p1760_p12 = scmp.lt.u32.totalorder %s1758_s27, %s1753_s11 }
  0x4d   : > { %p1762_p7 = scmp.lt.u32.totalorder %s1753_s11, %s2017_s10 }
  0x4e   : > { %p1756_p5 = pnand %p1755_p3, %p1754_p2  ;;  %p1761_p13 = por %p1760_p12, %p1759_p11 }
  0x50   : > { %p1757_p6 = pneg %p1756_p5  ;;  %p1763_p9 = por %p1762_p7, %p1761_p13 }
  0x52   : > { %p1764_p10 = pnand %p1763_p9, %p1757_p6 }
  0x54   : > { %1767 = shalt.err (!%p1764_p10)
}
  0x55   : > { %s1768_s30 = scalar_lea.vmem %s2019_s28, 256  ;;  %s1859_s6 = smov [#allocation4]  }
  0x56   : > { %p1769_p1 = scmp.ne.s32.totalorder %s2019_s28, %s1768_s30  ;;  %s1773_s9 = sshll.u32 %s1859_s6, 4  ;;  %s1774_s9 = int_to_ptr.vmem [resolvable:$false] %s1773_s9 }
  0x57   : > { %s1775_s29 = scalar_lea.vmem %s1774_s9, 512  ;;  %p1776_p2 = scmp.lt.s32.totalorder %s2019_s28, %s1774_s9 }
  0x58   : > { %p1771_p4 = pnand %p1769_p1, %p1755_p3  ;;  %p1777_p5 = scmp.lt.s32.totalorder %s1775_s29, %s1768_s30 }
  0x5a   : > { %p1772_p0 = pneg %p1771_p4  ;;  %p1778_p11 = por %p1777_p5, %p1776_p2 }
  0x5c   : > { %p1779_p12 = pnand %p1778_p11, %p1772_p0 }
  0x5e   : > { %1782 = shalt.err (!%p1779_p12)
}
  0x5f   : > { %s1860_s11 = smov 256   ;;  %p2956_p3 = scmp.ne.s32.totalorder %s2950_s26, 0 }
  0x60   : > { %1613 = dma.hbm_to_vmem [thread:$0]  (!%p2955_p8), %s2017_s10, 256, %s2019_s28, %s2021_s22, %s1860_s11, %s1857_s19, %s1858_s20  }
  0x61   : > { %178 = sbr.rel (%p2956_p3) target bundleno = 793 (0x319), region = 32 }
  0x68   : > { %s2054_s4 = sand.u32 1, %s1845_s13   ;;  %p2957_p6 = scmp.ne.s32.totalorder %s2947_s23, 0 }
  0x69   : > { %s1432_s17 = sshll.u32 %s2054_s4, 4  ;;  %s181_s27 = scalar_lea.sflag [#allocation5], %s2054_s4 }
  0x6a   : > { %s184_s7 = scalar_lea.vmem [#allocation4], %s1432_s17 }
  0x6b   : > { %1828 = dma.done.wait (%p2957_p6), %s181_s27, 256  }
  0x6c   : > { %1830 = vsyncadd (%p2957_p6), %s181_s27, 4294967040  ;;  %p2958_p13 = scmp.eq.s32.totalorder %s1906_s16, 0 }
  0x6e   : > { %1832 = dma.done.wait (%p2958_p13), [#allocation8], 704   ;;  %p2959_p8 = pmov %p2958_p13 }
  0x6f   : > { %v1861_v0 = vmov 0   ;;  %v2067_v1 = vld [vmem:[%s184_s7] sm:$0xff]  ;;  %v2069_v2 = vld [vmem:[%s184_s7 + $0x8] sm:$0xff]  ;;  %vm550_vm0 = vcmask 392192   ;;  %v2928_v5 = vmov 0.0   ;;  %s1435_s23 = sshll.u32 %s2054_s4, 3 }
  0x70   : > { %1834 = vsyncadd (%p2959_p8), [#allocation8], 4294966592  ;;  %557 = vmatprep.subr.bf16.mxu0 %v1861_v0  ;;  %v218_v3 = vsub.f32 0.0, %v2067_v1  ;;  %v219_v4 = vsub.f32 0.0, %v2069_v2  ;;  %vm230_vm1 = vcmp.ge.f32.partialorder %v2067_v1, 0.30769232 }
  0x71   : > { %vm231_vm2 = vcmp.ge.f32.partialorder %v2069_v2, 0.30769232  ;;  %v1436_v6 = vsel %vm230_vm1, 1.0, %v2928_v5  ;;  %vm238_vm3 = vcmp.ge.f32.partialorder %v2067_v1, 0.3846154  ;;  %s1543_s26 = sshll.u32 %s1906_s16, 7 }
  0x72   : > { %v1437_v7 = vsel %vm231_vm2, 1.0, %v2928_v5  ;;  %vm239_vm4 = vcmp.ge.f32.partialorder %v2069_v2, 0.3846154  ;;  %v220_v8 = vmul.f32 1.442695, %v218_v3  ;;  %v236_v10 = vadd.f32 3.0, %v1436_v6  ;;  %s2873_s28 = scalar_lea.hbm %s2920_s3, %s1543_s26 }
  0x73   : > { %v222_v9 = vmul.f32 1.442695, %v219_v4  ;;  %v237_v11 = vadd.f32 3.0, %v1437_v7  ;;  %v1438_v12 = vsel %vm238_vm3, 1.0, %v2928_v5  ;;  %v1439_v13 = vsel %vm239_vm4, 1.0, %v2928_v5  ;;  %s214_s19 = scalar_lea.vmem [#allocation10], %s1435_s23 }
  0x74   : > { %vm246_vm5 = vcmp.ge.f32.partialorder %v2067_v1, 0.46153846  ;;  %vm247_vm6 = vcmp.ge.f32.partialorder %v2069_v2, 0.46153846  ;;  %1673 = vpow2.f32 %v220_v8  ;;  %v244_v14 = vadd.f32 %v1438_v12, %v236_v10  ;;  %v1666_v17 = vld [vmem:[#allocation7 + $0x4] ss:$8 sps:$4 sm:$0xff]  }
  0x75   : > { %v245_v15 = vadd.f32 %v1439_v13, %v237_v11  ;;  %v1440_v16 = vsel %vm246_vm5, 1.0, %v2928_v5  ;;  %1675 = vpow2.f32 %v222_v9  ;;  %v1441_v18 = vsel %vm247_vm6, 1.0, %v2928_v5  ;;  %1472 = vmatprep.mubr.msk.bf16.mxu0 %vm550_vm0, %v1666_v17  ;;  %s1335_s20 = sshll.u32 %s214_s19, 4  ;;  %s1322_s22 = scalar_lea.sflag [#allocation6], %s2054_s4  ;;  %s2875_s20 = int_to_ptr.vmem [resolvable:$true] %s1335_s20 }
  0x76   : > { %vm254_vm7 = vcmp.ge.f32.partialorder %v2067_v1, 0.53846157  ;;  %vm255_vm8 = vcmp.ge.f32.partialorder %v2069_v2, 0.53846157  ;;  %v252_v19 = vadd.f32 %v1440_v16, %v244_v14  ;;  %vm262_vm9 = vcmp.ge.f32.partialorder %v2067_v1, 0.61538464 }
  0x77   : > { %v253_v20 = vadd.f32 %v1441_v18, %v245_v15  ;;  %v1442_v21 = vsel %vm254_vm7, 1.0, %v2928_v5  ;;  %v1443_v22 = vsel %vm255_vm8, 1.0, %v2928_v5  ;;  %vm263_vm10 = vcmp.ge.f32.partialorder %v2069_v2, 0.61538464  ;;  %s1783_s16 = scalar_lea.vmem %s2875_s20, 128  ;;  %p2999_p9 = scmp.ne.s32.totalorder %s2948_s24, 0 }
  0x78   : > { %vm270_vm11 = vcmp.ge.f32.partialorder %v2067_v1, 0.6923077  ;;  %v260_v23 = vadd.f32 %v1442_v21, %v252_v19  ;;  %v1444_v25 = vsel %vm262_vm9, 1.0, %v2928_v5  ;;  %v1445_v26 = vsel %vm263_vm10, 1.0, %v2928_v5  ;;  %p1784_p7 = scmp.ne.s32.totalorder %s2875_s20, %s1783_s16  ;;  %s1864_s8 = smov [#allocation10]  }
  0x79   : > { %v261_v24 = vadd.f32 %v1443_v22, %v253_v20  ;;  %vm271_vm12 = vcmp.ge.f32.partialorder %v2069_v2, 0.6923077  ;;  %v1446_v27 = vsel %vm270_vm11, 1.0, %v2928_v5  ;;  %s1787_s30 = sshll.u32 %s1864_s8, 4  ;;  %s1788_s30 = int_to_ptr.vmem [resolvable:$false] %s1787_s30 }
  0x7a   : > { %v268_v28 = vadd.f32 %v1444_v25, %v260_v23  ;;  %v1447_v30 = vsel %vm271_vm12, 1.0, %v2928_v5  ;;  %p1785_p10 = pnand %p1784_p7, %p2999_p9  ;;  %s1789_s6 = scalar_lea.vmem %s1788_s30, 256 }
  0x7b   : > { %v269_v29 = vadd.f32 %v1445_v26, %v261_v24  ;;  %p1790_p4 = scmp.lt.s32.totalorder %s2875_s20, %s1788_s30  ;;  %p1791_p0 = scmp.lt.s32.totalorder %s1789_s6, %s1783_s16 }
  0x7c   : > { %v2098_v31 = vadd.f32 %v1446_v27, %v268_v28  ;;  %p1786_p1 = pneg %p1785_p10 }
  0x7d   : > { %v2100_v32 = vadd.f32 %v1447_v30, %v269_v29  ;;  %p1792_p2 = por %p1791_p0, %p1790_p4 }
  0x7e   : > { %v1674_v33 = vpop.eup %1673  ;;  %v278_v34 = vadd.f32 1.0, %v2098_v31  ;;  %vm361_vm13 = vcmp.eq.f32.partialorder %v2098_v31, 3.0  ;;  %v311_v40 = vadd.f32 2.0, %v2098_v31  ;;  %vm367_vm15 = vcmp.eq.f32.partialorder %v2098_v31, 4.0 }
  0x7f   : > { %v279_v35 = vadd.f32 1.0, %v2100_v32  ;;  %vm362_vm14 = vcmp.eq.f32.partialorder %v2100_v32, 3.0  ;;  %v1676_v36 = vpop.eup %1675  ;;  %v224_v37 = vadd.f32 1.0, %v1674_v33  ;;  %v2107_v38 = vsel %vm361_vm13, 1.0, %v2928_v5  ;;  %p1793_p5 = pnand %p1792_p2, %p1786_p1 }
  0x80   : > { %v2110_v39 = vsel %vm362_vm14, 1.0, %v2928_v5  ;;  %v225_v41 = vadd.f32 1.0, %v1676_v36  ;;  %v281_v42 = vmul.f32 0.07692308, %v278_v34  ;;  %v1450_v44 = vadd.f32 -2.0, %v278_v34 }
  0x81   : > { %v282_v43 = vmul.f32 0.07692308, %v279_v35  ;;  %1677 = vrcp.f32 %v224_v37  ;;  %v1451_v45 = vadd.f32 -2.0, %v279_v35  ;;  %v1448_v46 = vadd.f32 -1.0, %v278_v34 }
  0x82   : > { %v1449_v47 = vadd.f32 -1.0, %v279_v35  ;;  %1679 = vrcp.f32 %v225_v41  ;;  %v283_v48 = vsub.f32 %v281_v42, %v2067_v1  ;;  %v299_v50 = vmul.f32 0.07692308, %v1450_v44 }
  0x83   : > { %v284_v49 = vsub.f32 %v282_v43, %v2069_v2  ;;  %v300_v51 = vmul.f32 0.07692308, %v1451_v45  ;;  %v287_v52 = vmul.f32 0.07692308, %v1448_v46  ;;  %v312_v57 = vadd.f32 2.0, %v2100_v32 }
  0x84   : > { %v288_v53 = vmul.f32 0.07692308, %v1449_v47  ;;  %v291_v54 = vmul.f32 13.0, %v283_v48  ;;  %v301_v56 = vsub.f32 %v2067_v1, %v299_v50  ;;  %v313_v61 = vmul.f32 0.07692308, %v311_v40 }
  0x85   : > { %v292_v55 = vmul.f32 13.0, %v284_v49  ;;  %v302_v58 = vsub.f32 %v2069_v2, %v300_v51  ;;  %v2119_v59 = vsub.f32 %v2067_v1, %v287_v52  ;;  %v314_v3 = vmul.f32 0.07692308, %v312_v57 }
  0x86   : > { %v2122_v60 = vsub.f32 %v2069_v2, %v288_v53  ;;  %v303_v62 = vmul.f32 6.5, %v291_v54  ;;  %v1452_v4 = vadd.f32 -3.0, %v278_v34  ;;  %v315_v8 = vsub.f32 %v313_v61, %v2067_v1 }
  0x87   : > { %v304_v63 = vmul.f32 6.5, %v292_v55  ;;  %v295_v6 = vmul.f32 13.0, %v2119_v59  ;;  %v1453_v9 = vadd.f32 -3.0, %v279_v35  ;;  %v316_v14 = vsub.f32 %v314_v3, %v2069_v2 }
  0x88   : > { %v296_v7 = vmul.f32 13.0, %v2122_v60  ;;  %v305_v10 = vmul.f32 %v303_v62, %v283_v48  ;;  %v309_v12 = vmul.f32 %v303_v62, %v301_v56  ;;  %v327_v17 = vmul.f32 0.07692308, %v1452_v4 }
  0x89   : > { %v306_v11 = vmul.f32 %v304_v63, %v284_v49  ;;  %v310_v13 = vmul.f32 %v304_v63, %v302_v58  ;;  %v317_v15 = vmul.f32 6.5, %v295_v6  ;;  %v328_v20 = vmul.f32 0.07692308, %v1453_v9 }
  0x8a   : > { %v318_v16 = vmul.f32 6.5, %v296_v7  ;;  %v331_v18 = vmul.f32 4.3333335, %v305_v10  ;;  %v329_v24 = vsub.f32 %v2067_v1, %v327_v17  ;;  %vm368_vm1 = vcmp.eq.f32.partialorder %v2100_v32, 4.0 }
  0x8b   : > { %v332_v19 = vmul.f32 4.3333335, %v306_v11  ;;  %v1678_v21 = vpop.eup %1677  ;;  %v319_v22 = vmul.f32 %v317_v15, %v315_v8  ;;  %v330_v29 = vsub.f32 %v2069_v2, %v328_v20  ;;  %v2145_v44 = vsel %vm367_vm15, 1.0, %v2928_v5 }
  0x8c   : > { %v320_v23 = vmul.f32 %v318_v16, %v316_v14  ;;  %v1680_v25 = vpop.eup %1679  ;;  %v228_v26 = vmul.f32 %v1678_v21, %v2067_v1  ;;  %v2131_v27 = vmul.f32 %v331_v18, %v283_v48  ;;  %v337_v35 = vmul.f32 %v331_v18, %v329_v24 }
  0x8d   : > { %v2133_v28 = vmul.f32 %v332_v19, %v284_v49  ;;  %v229_v30 = vmul.f32 %v1680_v25, %v2069_v2  ;;  %v321_v33 = vadd.f32 %v319_v22, %v309_v12  ;;  %v338_v40 = vmul.f32 %v332_v19, %v330_v29 }
  0x8e   : > { %v322_v34 = vadd.f32 %v320_v23, %v310_v13  ;;  %v403_v36 = vmul.f32 %v2107_v38, %v2131_v27  ;;  %v2148_v46 = vsel %vm368_vm1, 1.0, %v2928_v5  ;;  %v405_v47 = vmul.f32 %v2145_v44, %v2131_v27 }
  0x8f   : > { %v404_v37 = vmul.f32 %v2110_v39, %v2133_v28  ;;  %v495_v41 = vpack.c.bf16 %v229_v30, %v228_v26  ;;  %v339_v42 = vmul.f32 4.3333335, %v321_v33  ;;  %v323_v48 = vmul.f32 %v317_v15, %v2119_v59 }
  0x90   : > { %v340_v43 = vmul.f32 4.3333335, %v322_v34  ;;  %v406_v51 = vmul.f32 %v2148_v46, %v2133_v28  ;;  %v324_v52 = vmul.f32 %v318_v16, %v2122_v60  ;;  %v347_v55 = vadd.f32 3.0, %v2098_v31 }
  0x91   : > { %v497_v45 = vpack.c.bf16 %v404_v37, %v403_v36  ;;  %558 = vmatpush1.bf16.msra.mxu0 %v495_v41  ;;  %v341_v49 = vmul.f32 %v339_v42, %v315_v8  ;;  %v345_v53 = vmul.f32 %v339_v42, %v301_v56  ;;  %v348_v57 = vadd.f32 3.0, %v2100_v32 }
  0x92   : > { %v342_v50 = vmul.f32 %v340_v43, %v316_v14  ;;  %559 = vmatprep.subr.bf16.mxu0 %v1861_v0  ;;  %v346_v54 = vmul.f32 %v340_v43, %v302_v58  ;;  %v353_v63 = vmul.f32 4.3333335, %v323_v48  ;;  %v354_v3 = vmul.f32 4.3333335, %v324_v52 }
  0x93   : > { %v2159_v61 = vadd.f32 %v341_v49, %v337_v35  ;;  %v349_v4 = vmul.f32 0.07692308, %v347_v55  ;;  %v350_v6 = vmul.f32 0.07692308, %v348_v57  ;;  %vm373_vm2 = vcmp.eq.f32.partialorder %v2098_v31, 5.0 }
  0x94   : > { %v2161_v62 = vadd.f32 %v342_v50, %v338_v40  ;;  %vm374_vm3 = vcmp.eq.f32.partialorder %v2100_v32, 5.0  ;;  %v2170_v7 = vsel %vm373_vm2, 1.0, %v2928_v5  ;;  %vm379_vm4 = vcmp.eq.f32.partialorder %v2098_v31, 6.0 }
  0x95   : > { %560 = vmatpush1.bf16.msra.mxu0 %v497_v45  ;;  %v407_v56 = vmul.f32 %v2107_v38, %v2159_v61  ;;  %v2173_v8 = vsel %vm374_vm3, 1.0, %v2928_v5  ;;  %v351_v9 = vsub.f32 %v349_v4, %v2067_v1  ;;  %v352_v10 = vsub.f32 %v350_v6, %v2069_v2 }
  0x96   : > { %v408_v58 = vmul.f32 %v2110_v39, %v2161_v62  ;;  %561 = vmatprep.subr.bf16.mxu0 %v1861_v0  ;;  %v411_v11 = vmul.f32 %v2170_v7, %v2131_v27  ;;  %v412_v12 = vmul.f32 %v2173_v8, %v2133_v28  ;;  %v413_v15 = vmul.f32 %v2145_v44, %v2159_v61 }
  0x97   : > { %v409_v13 = vadd.f32 %v407_v56, %v405_v47  ;;  %v414_v16 = vmul.f32 %v2148_v46, %v2161_v62  ;;  %v355_v17 = vmul.f32 %v353_v63, %v351_v9  ;;  %v356_v18 = vmul.f32 %v354_v3, %v352_v10 }
  0x98   : > { %v410_v14 = vadd.f32 %v408_v58, %v406_v51  ;;  %v2187_v1 = vmul.f32 %v353_v63, %v2119_v59  ;;  %v2190_v2 = vmul.f32 %v354_v3, %v2122_v60  ;;  %v415_v20 = vadd.f32 %v413_v15, %v411_v11 }
  0x99   : > { %v416_v21 = vadd.f32 %v414_v16, %v412_v12  ;;  %v2193_v22 = vadd.f32 %v355_v17, %v345_v53  ;;  %v2195_v23 = vadd.f32 %v356_v18, %v346_v54  ;;  %vm380_vm5 = vcmp.eq.f32.partialorder %v2100_v32, 6.0 }
  0x9a   : > { %v499_v19 = vpack.c.bf16 %v410_v14, %v409_v13  ;;  %v2199_v24 = vsel %vm379_vm4, 1.0, %v2928_v5  ;;  %v2202_v59 = vsel %vm380_vm5, 1.0, %v2928_v5  ;;  %v423_v25 = vmul.f32 %v2170_v7, %v2159_v61 }
  0x9b   : > { %v421_v60 = vmul.f32 %v2199_v24, %v2131_v27  ;;  %v424_v26 = vmul.f32 %v2173_v8, %v2161_v62  ;;  %v417_v29 = vmul.f32 %v2107_v38, %v2193_v22  ;;  %v418_v30 = vmul.f32 %v2110_v39, %v2195_v23 }
  0x9c   : > { %562 = vmatpush1.bf16.msra.mxu0 %v499_v19  ;;  %v422_v33 = vmul.f32 %v2202_v59, %v2133_v28  ;;  %v427_v34 = vmul.f32 %v2145_v44, %v2193_v22  ;;  %v428_v36 = vmul.f32 %v2148_v46, %v2195_v23  ;;  %v431_v37 = vmul.f32 %v2107_v38, %v2187_v1 }
  0x9d   : > { %563 = vmatprep.subr.bf16.mxu0 %v1861_v0  ;;  %v425_v35 = vadd.f32 %v423_v25, %v421_v60  ;;  %v432_v40 = vmul.f32 %v2110_v39, %v2190_v2  ;;  %v419_v41 = vadd.f32 %v417_v29, %v415_v20  ;;  %v420_v42 = vadd.f32 %v418_v30, %v416_v21 }
  0x9e   : > { %v426_v43 = vadd.f32 %v424_v26, %v422_v33  ;;  %vm385_vm6 = vcmp.eq.f32.partialorder %v2098_v31, 7.0  ;;  %vm386_vm7 = vcmp.eq.f32.partialorder %v2100_v32, 7.0  ;;  %v437_v48 = vmul.f32 %v2199_v24, %v2159_v61 }
  0x9f   : > { %v429_v45 = vadd.f32 %v427_v34, %v425_v35  ;;  %v2228_v47 = vsel %vm385_vm6, 1.0, %v2928_v5  ;;  %v501_v49 = vpack.c.bf16 %v420_v42, %v419_v41  ;;  %v2233_v38 = vsel %vm386_vm7, 1.0, %v2928_v5 }
  0xa0   : > { %v430_v50 = vadd.f32 %v428_v36, %v426_v43  ;;  %v435_v39 = vmul.f32 %v2228_v47, %v2131_v27  ;;  %v436_v52 = vmul.f32 %v2233_v38, %v2133_v28  ;;  %v438_v53 = vmul.f32 %v2202_v59, %v2161_v62 }
  0xa1   : > { %v433_v51 = vadd.f32 %v431_v37, %v429_v45  ;;  %v441_v54 = vmul.f32 %v2170_v7, %v2193_v22  ;;  %564 = vmatpush1.bf16.msra.mxu0 %v501_v49  ;;  %v442_v63 = vmul.f32 %v2173_v8, %v2195_v23  ;;  %v445_v3 = vmul.f32 %v2145_v44, %v2187_v1 }
  0xa2   : > { %v434_v55 = vadd.f32 %v432_v40, %v430_v50  ;;  %v439_v57 = vadd.f32 %v437_v48, %v435_v39  ;;  %565 = vmatprep.subr.bf16.mxu0 %v1861_v0  ;;  %v440_v4 = vadd.f32 %v438_v53, %v436_v52  ;;  %v446_v6 = vmul.f32 %v2148_v46, %v2190_v2 }
  0xa3   : > { %vm391_vm8 = vcmp.eq.f32.partialorder %v2098_v31, 8.0  ;;  %vm392_vm9 = vcmp.eq.f32.partialorder %v2100_v32, 8.0  ;;  %v451_v13 = vmul.f32 %v2228_v47, %v2159_v61  ;;  %v452_v14 = vmul.f32 %v2233_v38, %v2161_v62 }
  0xa4   : > { %v503_v56 = vpack.c.bf16 %v434_v55, %v433_v51  ;;  %v443_v58 = vadd.f32 %v441_v54, %v439_v57  ;;  %v1464_v9 = vsel %vm391_vm8, 1.0, %v2928_v5  ;;  %v1465_v10 = vsel %vm392_vm9, 1.0, %v2928_v5 }
  0xa5   : > { %v444_v11 = vadd.f32 %v442_v63, %v440_v4  ;;  %v449_v12 = vmul.f32 %v1464_v9, %v2131_v27  ;;  %v450_v44 = vmul.f32 %v1465_v10, %v2133_v28  ;;  %v455_v15 = vmul.f32 %v2199_v24, %v2193_v22 }
  0xa6   : > { %566 = vmatpush1.bf16.msra.mxu0 %v503_v56  ;;  %v447_v46 = vadd.f32 %v445_v3, %v443_v58  ;;  %v456_v16 = vmul.f32 %v2202_v59, %v2195_v23  ;;  %v459_v19 = vmul.f32 %v2170_v7, %v2187_v1  ;;  %v460_v20 = vmul.f32 %v2173_v8, %v2190_v2  ;;  %v1664_v58 = vld [vmem:[#allocation7] ss:$8 sps:$4 sm:$0xff]  }
  0xa7   : > { %567 = vmatprep.subr.bf16.mxu0 %v1861_v0  ;;  %v448_v17 = vadd.f32 %v446_v6, %v444_v11  ;;  %v453_v18 = vadd.f32 %v451_v13, %v449_v12  ;;  %v454_v21 = vadd.f32 %v452_v14, %v450_v44  ;;  %vm397_vm10 = vcmp.eq.f32.partialorder %v2098_v31, 9.0 }
  0xa8   : > { %vm398_vm11 = vcmp.eq.f32.partialorder %v2100_v32, 9.0  ;;  %v465_v60 = vmul.f32 %v1464_v9, %v2159_v61  ;;  %v1466_v29 = vsel %vm397_vm10, 1.0, %v2928_v5  ;;  %v466_v8 = vmul.f32 %v1465_v10, %v2161_v62 }
  0xa9   : > { %v505_v25 = vpack.c.bf16 %v448_v17, %v447_v46  ;;  %v457_v26 = vadd.f32 %v455_v15, %v453_v18  ;;  %v1467_v30 = vsel %vm398_vm11, 1.0, %v2928_v5  ;;  %v458_v33 = vadd.f32 %v456_v16, %v454_v21 }
  0xaa   : > { %v463_v34 = vmul.f32 %v1466_v29, %v2131_v27  ;;  %v464_v7 = vmul.f32 %v1467_v30, %v2133_v28  ;;  %v469_v31 = vmul.f32 %v2228_v47, %v2193_v22  ;;  %v470_v32 = vmul.f32 %v2233_v38, %v2195_v23 }
  0xab   : > { %568 = vmatpush1.bf16.msra.mxu0 %v505_v25  ;;  %v461_v35 = vadd.f32 %v459_v19, %v457_v26  ;;  %v473_v36 = vmul.f32 %v2199_v24, %v2187_v1  ;;  %v462_v37 = vadd.f32 %v460_v20, %v458_v33  ;;  %v474_v28 = vmul.f32 %v2202_v59, %v2190_v2  ;;  %v2330_v26 = vld [vmem:[#allocation9] sm:$0xff] }
  0xac   : > { %569 = vmatprep.subr.bf16.mxu0 %v1861_v0  ;;  %v467_v40 = vadd.f32 %v465_v60, %v463_v34  ;;  %v468_v27 = vadd.f32 %v466_v8, %v464_v7  ;;  %v477_v41 = vmul.f32 %v1466_v29, %v2159_v61  ;;  %v478_v42 = vmul.f32 %v1467_v30, %v2161_v62 }
  0xad   : > { %v479_v43 = vmul.f32 %v1464_v9, %v2193_v22  ;;  %v480_v45 = vmul.f32 %v1465_v10, %v2195_v23  ;;  %v507_v48 = vpack.c.bf16 %v462_v37, %v461_v35  ;;  %v483_v24 = vmul.f32 %v2228_v47, %v2187_v1  ;;  %2960 = vst [vmem:[#allocation14_spill] sm:$0xff] %v2330_v26 }
  0xae   : > { %v471_v49 = vadd.f32 %v469_v31, %v467_v40  ;;  %v472_v50 = vadd.f32 %v470_v32, %v468_v27  ;;  %v484_v52 = vmul.f32 %v2233_v38, %v2190_v2  ;;  %v487_v59 = vmul.f32 %v1466_v29, %v2193_v22 }
  0xaf   : > { %v481_v39 = vadd.f32 %v479_v43, %v477_v41  ;;  %v482_v51 = vadd.f32 %v480_v45, %v478_v42  ;;  %570 = vmatpush1.bf16.msra.mxu0 %v507_v48  ;;  %v488_v53 = vmul.f32 %v1467_v30, %v2195_v23  ;;  %v489_v54 = vmul.f32 %v1464_v9, %v2187_v1  ;;  %v1667_v9 = vld [vmem:[#allocation7 + $0x14] ss:$8 sps:$4 sm:$0xff]  }
  0xb0   : > { %v475_v61 = vadd.f32 %v473_v36, %v471_v49  ;;  %v476_v62 = vadd.f32 %v474_v28, %v472_v50  ;;  %571 = vmatprep.subr.bf16.mxu0 %v1861_v0  ;;  %v490_v47 = vmul.f32 %v1465_v10, %v2190_v2  ;;  %v493_v6 = vmul.f32 %v1466_v29, %v2187_v1  ;;  %v1669_v10 = vld [vmem:[#allocation7 + $0x10] ss:$8 sps:$4 sm:$0xff]  }
  0xb1   : > { %v485_v55 = vadd.f32 %v483_v24, %v481_v39  ;;  %v486_v57 = vadd.f32 %v484_v52, %v482_v51  ;;  %v491_v4 = vadd.f32 %v489_v54, %v487_v59  ;;  %v494_v23 = vmul.f32 %v1467_v30, %v2190_v2 }
  0xb2   : > { %v509_v63 = vpack.c.bf16 %v476_v62, %v475_v61  ;;  %v492_v38 = vadd.f32 %v490_v47, %v488_v53  ;;  %v1539_v37 = vcombine.high %v2330_v26, %v2330_v26 }
  0xb3   : > { %v511_v3 = vpack.c.bf16 %v486_v57, %v485_v55  ;;  %v515_v56 = vpack.c.bf16 %v494_v23, %v493_v6 }
  0xb4   : > { %572 = vmatpush1.bf16.msra.mxu0 %v509_v63  ;;  %v513_v22 = vpack.c.bf16 %v492_v38, %v491_v4  ;;  %1272 = vmatprep.mubr.bf16.mxu1 %v1539_v37 }
  0xb5   : > { %573 = vmatprep.subr.bf16.mxu0 %v1861_v0 }
  0xb8   : > { %574 = vmatpush1.bf16.msra.mxu0 %v511_v3 }
  0xb9   : > { %575 = vmatprep.subr.bf16.mxu0 %v1861_v0 }
  0xbc   : > { %576 = vmatpush1.bf16.msra.mxu0 %v513_v22 }
  0xbd   : > { %577 = vmatprep.subr.bf16.mxu0 %v1861_v0 }
  0xc0   : > { %578 = vmatpush1.bf16.msra.mxu0 %v515_v56 }
  0xc3   : > { %590 = vmatmul.mubr.bf16.vlgmr.msra.gmra.mrb[0].mxu0 %v1664_v58 }
  0xc4   : > { %1473 = vmatprep.mubr.msk.bf16.mxu0 %vm550_vm0, %v1667_v9 }
  0xcb   : > { %598 = vmatmul.mubr.bf16.gmra.mrb[4].mxu0 %v1669_v10 }
 0x196   : > { %v2305_v11 = vpop.f32.mrb[0].mxu0 }
 0x197   : > { %vm630_vm12 = vcmp.ge.f32.partialorder %v2305_v11, 0.30769232  ;;  %vm646_vm13 = vcmp.ge.f32.partialorder %v2305_v11, 0.3846154  ;;  %vm662_vm14 = vcmp.ge.f32.partialorder %v2305_v11, 0.46153846 }
 0x198   : > { %v1474_v1 = vsel %vm630_vm12, 1.0, %v2928_v5  ;;  %vm678_vm15 = vcmp.ge.f32.partialorder %v2305_v11, 0.53846157  ;;  %v593_v0 = vpop.f32.mrb[1].mxu0  ;;  %v1478_v12 = vsel %vm646_vm13, 1.0, %v2928_v5  ;;  %v1482_v44 = vsel %vm662_vm14, 1.0, %v2928_v5 }
 0x199   : > { %v642_v2 = vadd.f32 3.0, %v1474_v1  ;;  %vm694_vm0 = vcmp.ge.f32.partialorder %v2305_v11, 0.61538464  ;;  %vm710_vm1 = vcmp.ge.f32.partialorder %v2305_v11, 0.6923077  ;;  %v1486_v13 = vsel %vm678_vm15, 1.0, %v2928_v5 }
 0x19a   : > { %v1490_v46 = vsel %vm694_vm0, 1.0, %v2928_v5  ;;  %v1494_v14 = vsel %vm710_vm1, 1.0, %v2928_v5  ;;  %v2319_v15 = vpop.f32.mrb[2].mxu0  ;;  %v606_v20 = vsub.f32 0.0, %v2305_v11 }
 0x19b   : > { %v658_v16 = vadd.f32 %v1478_v12, %v642_v2  ;;  %vm631_vm2 = vcmp.ge.f32.partialorder %v2319_v15, 0.30769232  ;;  %vm647_vm3 = vcmp.ge.f32.partialorder %v2319_v15, 0.3846154  ;;  %vm663_vm4 = vcmp.ge.f32.partialorder %v2319_v15, 0.46153846 }
 0x19c   : > { %v1475_v17 = vsel %vm631_vm2, 1.0, %v2928_v5  ;;  %v1479_v18 = vsel %vm647_vm3, 1.0, %v2928_v5  ;;  %vm679_vm5 = vcmp.ge.f32.partialorder %v2319_v15, 0.53846157  ;;  %v596_v19 = vpop.f32.mrb[3].mxu0  ;;  %v1483_v25 = vsel %vm663_vm4, 1.0, %v2928_v5 }
 0x19d   : > { %v674_v21 = vadd.f32 %v1482_v44, %v658_v16  ;;  %v643_v60 = vadd.f32 3.0, %v1475_v17  ;;  %vm695_vm6 = vcmp.ge.f32.partialorder %v2319_v15, 0.61538464  ;;  %v1487_v29 = vsel %vm679_vm5, 1.0, %v2928_v5 }
 0x19e   : > { %v1491_v30 = vsel %vm695_vm6, 1.0, %v2928_v5  ;;  %vm711_vm7 = vcmp.ge.f32.partialorder %v2319_v15, 0.6923077  ;;  %v2335_v33 = vpop.f32.mrb[4].mxu0  ;;  %v607_v34 = vsub.f32 0.0, %v2319_v15 }
 0x19f   : > { %v690_v7 = vadd.f32 %v1486_v13, %v674_v21  ;;  %v659_v8 = vadd.f32 %v1479_v18, %v643_v60  ;;  %v1495_v35 = vsel %vm711_vm7, 1.0, %v2928_v5  ;;  %vm632_vm8 = vcmp.ge.f32.partialorder %v2335_v33, 0.30769232  ;;  %v601_v31 = vpop.f32.mrb[5].mxu0 }
 0x1a0   : > { %v1476_v32 = vsel %vm632_vm8, 1.0, %v2928_v5  ;;  %vm648_vm9 = vcmp.ge.f32.partialorder %v2335_v33, 0.3846154  ;;  %vm664_vm10 = vcmp.ge.f32.partialorder %v2335_v33, 0.46153846  ;;  %v2343_v36 = vpop.f32.mrb[6].mxu0 }
 0x1a1   : > { %v706_v40 = vadd.f32 %v1490_v46, %v690_v7  ;;  %v675_v27 = vadd.f32 %v1483_v25, %v659_v8  ;;  %v644_v28 = vadd.f32 3.0, %v1476_v32  ;;  %v1480_v41 = vsel %vm648_vm9, 1.0, %v2928_v5  ;;  %v604_v42 = vpop.f32.mrb[7].mxu0 }
 0x1a2   : > { %v1484_v43 = vsel %vm664_vm10, 1.0, %v2928_v5  ;;  %vm680_vm11 = vcmp.ge.f32.partialorder %v2335_v33, 0.53846157  ;;  %vm696_vm12 = vcmp.ge.f32.partialorder %v2335_v33, 0.61538464  ;;  %v608_v45 = vsub.f32 0.0, %v2335_v33 }
 0x1a3   : > { %v2352_v48 = vadd.f32 %v1494_v14, %v706_v40  ;;  %v691_v49 = vadd.f32 %v1487_v29, %v675_v27  ;;  %v660_v50 = vadd.f32 %v1480_v41, %v644_v28  ;;  %v1488_v24 = vsel %vm680_vm11, 1.0, %v2928_v5 }
 0x1a4   : > { %v1492_v39 = vsel %vm696_vm12, 1.0, %v2928_v5  ;;  %vm712_vm13 = vcmp.ge.f32.partialorder %v2335_v33, 0.6923077  ;;  %vm633_vm14 = vcmp.ge.f32.partialorder %v2343_v36, 0.30769232  ;;  %v609_v51 = vsub.f32 0.0, %v2343_v36 }
 0x1a5   : > { %v707_v52 = vadd.f32 %v1491_v30, %v691_v49  ;;  %v676_v59 = vadd.f32 %v1484_v43, %v660_v50  ;;  %v1496_v61 = vsel %vm712_vm13, 1.0, %v2928_v5  ;;  %v1477_v62 = vsel %vm633_vm14, 1.0, %v2928_v5 }
 0x1a6   : > { %v645_v53 = vadd.f32 3.0, %v1477_v62  ;;  %vm649_vm15 = vcmp.ge.f32.partialorder %v2343_v36, 0.3846154  ;;  %vm665_vm0 = vcmp.ge.f32.partialorder %v2343_v36, 0.46153846  ;;  %v726_v54 = vadd.f32 1.0, %v2352_v48 }
 0x1a7   : > { %v2364_v55 = vadd.f32 %v1495_v35, %v707_v52  ;;  %v692_v57 = vadd.f32 %v1488_v24, %v676_v59  ;;  %v1481_v47 = vsel %vm649_vm15, 1.0, %v2928_v5  ;;  %v1485_v63 = vsel %vm665_vm0, 1.0, %v2928_v5 }
 0x1a8   : > { %v661_v3 = vadd.f32 %v1481_v47, %v645_v53  ;;  %vm681_vm1 = vcmp.ge.f32.partialorder %v2343_v36, 0.53846157  ;;  %vm697_vm2 = vcmp.ge.f32.partialorder %v2343_v36, 0.61538464  ;;  %vm713_vm3 = vcmp.ge.f32.partialorder %v2343_v36, 0.6923077 }
 0x1a9   : > { %v708_v4 = vadd.f32 %v1492_v39, %v692_v57  ;;  %v1489_v38 = vsel %vm681_vm1, 1.0, %v2928_v5  ;;  %v1493_v22 = vsel %vm697_vm2, 1.0, %v2928_v5  ;;  %v1497_v6 = vsel %vm713_vm3, 1.0, %v2928_v5 }
 0x1aa   : > { %v677_v23 = vadd.f32 %v1485_v63, %v661_v3  ;;  %v727_v56 = vadd.f32 1.0, %v2364_v55  ;;  %v730_v58 = vmul.f32 0.07692308, %v726_v54  ;;  %v1498_v9 = vadd.f32 -1.0, %v726_v54 }
 0x1ab   : > { %v2375_v10 = vadd.f32 %v1496_v61, %v708_v4  ;;  %v1502_v1 = vadd.f32 -2.0, %v726_v54  ;;  %v790_v0 = vadd.f32 2.0, %v2352_v48  ;;  %v791_v2 = vadd.f32 2.0, %v2364_v55 }
 0x1ac   : > { %v693_v12 = vadd.f32 %v1489_v38, %v677_v23  ;;  %v731_v44 = vmul.f32 0.07692308, %v727_v56  ;;  %v734_v13 = vsub.f32 %v730_v58, %v2305_v11  ;;  %v1499_v46 = vadd.f32 -1.0, %v727_v56 }
 0x1ad   : > { %2961 = vst [vmem:[#allocation15_spill] sm:$0xff] %v2375_v10  ;;  %v742_v14 = vmul.f32 0.07692308, %v1498_v9  ;;  %v1503_v16 = vadd.f32 -2.0, %v727_v56  ;;  %v766_v17 = vmul.f32 0.07692308, %v1502_v1 }
 0x1ae   : > { %v1506_v18 = vadd.f32 -3.0, %v726_v54  ;;  %v709_v19 = vadd.f32 %v1493_v22, %v693_v12  ;;  %v735_v21 = vsub.f32 %v731_v44, %v2319_v15  ;;  %v743_v60 = vmul.f32 0.07692308, %v1499_v46 }
 0x1af   : > { %v750_v25 = vmul.f32 13.0, %v734_v13  ;;  %v746_v29 = vsub.f32 %v2305_v11, %v742_v14  ;;  %v767_v30 = vmul.f32 0.07692308, %v1503_v16  ;;  %v770_v7 = vsub.f32 %v2305_v11, %v766_v17 }
 0x1b0   : > { %v794_v8 = vmul.f32 0.07692308, %v790_v0  ;;  %v2383_v35 = vadd.f32 %v1497_v6, %v709_v19  ;;  %v747_v31 = vsub.f32 %v2319_v15, %v743_v60  ;;  %v751_v32 = vmul.f32 13.0, %v735_v21 }
 0x1b1   : > { %v774_v37 = vmul.f32 6.5, %v750_v25  ;;  %v758_v40 = vmul.f32 13.0, %v746_v29  ;;  %v771_v27 = vsub.f32 %v2319_v15, %v767_v30  ;;  %v795_v28 = vmul.f32 0.07692308, %v791_v2 }
 0x1b2   : > { %v798_v41 = vsub.f32 %v794_v8, %v2305_v11  ;;  %v759_v42 = vmul.f32 13.0, %v747_v31  ;;  %v775_v43 = vmul.f32 6.5, %v751_v32  ;;  %v1507_v52 = vadd.f32 -3.0, %v727_v56 }
 0x1b3   : > { %v778_v49 = vmul.f32 %v774_v37, %v734_v13  ;;  %v786_v50 = vmul.f32 %v774_v37, %v770_v7  ;;  %v799_v24 = vsub.f32 %v795_v28, %v2319_v15  ;;  %v802_v39 = vmul.f32 6.5, %v758_v40 }
 0x1b4   : > { %v822_v59 = vmul.f32 0.07692308, %v1506_v18  ;;  %v779_v61 = vmul.f32 %v775_v43, %v735_v21  ;;  %v787_v62 = vmul.f32 %v775_v43, %v771_v27  ;;  %v803_v53 = vmul.f32 6.5, %v759_v42 }
 0x1b5   : > { %v830_v54 = vmul.f32 4.3333335, %v778_v49  ;;  %v806_v57 = vmul.f32 %v802_v39, %v798_v41  ;;  %v814_v47 = vmul.f32 %v802_v39, %v746_v29  ;;  %v823_v63 = vmul.f32 0.07692308, %v1507_v52 }
 0x1b6   : > { %v826_v3 = vsub.f32 %v2305_v11, %v822_v59  ;;  %v807_v4 = vmul.f32 %v803_v53, %v799_v24  ;;  %v815_v38 = vmul.f32 %v803_v53, %v747_v31  ;;  %v831_v22 = vmul.f32 4.3333335, %v779_v61 }
 0x1b7   : > { %v2390_v6 = vmul.f32 %v830_v54, %v734_v13  ;;  %v810_v23 = vadd.f32 %v806_v57, %v786_v50  ;;  %v827_v58 = vsub.f32 %v2319_v15, %v823_v63  ;;  %v862_v56 = vadd.f32 3.0, %v2352_v48 }
 0x1b8   : > { %v842_v9 = vmul.f32 %v830_v54, %v826_v3  ;;  %v811_v1 = vadd.f32 %v807_v4, %v787_v62  ;;  %v2394_v0 = vmul.f32 %v831_v22, %v735_v21  ;;  %v863_v2 = vadd.f32 3.0, %v2364_v55 }
 0x1b9   : > { %v874_v12 = vmul.f32 4.3333335, %v814_v47  ;;  %v843_v44 = vmul.f32 %v831_v22, %v827_v58  ;;  %v846_v46 = vmul.f32 4.3333335, %v810_v23  ;;  %v866_v14 = vmul.f32 0.07692308, %v862_v56 }
 0x1ba   : > { %v875_v16 = vmul.f32 4.3333335, %v815_v38  ;;  %v847_v17 = vmul.f32 4.3333335, %v811_v1  ;;  %v867_v18 = vmul.f32 0.07692308, %v863_v2 }
 0x1bb   : > { %v2397_v13 = vmul.f32 %v874_v12, %v746_v29  ;;  %vm890_vm4 = vcmp.eq.f32.partialorder %v2352_v48, 3.0  ;;  %v850_v19 = vmul.f32 %v846_v46, %v798_v41  ;;  %v858_v60 = vmul.f32 %v846_v46, %v770_v7 }
 0x1bc   : > { %v870_v25 = vsub.f32 %v866_v14, %v2305_v11  ;;  %v2401_v30 = vmul.f32 %v875_v16, %v747_v31  ;;  %v851_v21 = vmul.f32 %v847_v17, %v799_v24  ;;  %v859_v8 = vmul.f32 %v847_v17, %v771_v27 }
 0x1bd   : > { %v871_v32 = vsub.f32 %v867_v18, %v2319_v15  ;;  %vm891_vm5 = vcmp.eq.f32.partialorder %v2364_v55, 3.0  ;;  %v2405_v37 = vadd.f32 %v850_v19, %v842_v9  ;;  %v2408_v29 = vsel %vm890_vm4, 1.0, %v2928_v5 }
 0x1be   : > { %v878_v40 = vmul.f32 %v874_v12, %v870_v25  ;;  %v2411_v28 = vsel %vm891_vm5, 1.0, %v2928_v5  ;;  %v2413_v7 = vadd.f32 %v851_v21, %v843_v44  ;;  %vm902_vm6 = vcmp.eq.f32.partialorder %v2352_v48, 4.0 }
 0x1bf   : > { %v879_v41 = vmul.f32 %v875_v16, %v871_v32  ;;  %vm903_vm7 = vcmp.eq.f32.partialorder %v2364_v55, 4.0  ;;  %v2420_v27 = vsel %vm902_vm6, 1.0, %v2928_v5  ;;  %vm914_vm8 = vcmp.eq.f32.partialorder %v2352_v48, 5.0 }
 0x1c0   : > { %v2417_v31 = vadd.f32 %v878_v40, %v858_v60  ;;  %v2423_v42 = vsel %vm903_vm7, 1.0, %v2928_v5  ;;  %vm915_vm9 = vcmp.eq.f32.partialorder %v2364_v55, 5.0  ;;  %v2430_v49 = vsel %vm914_vm8, 1.0, %v2928_v5 }
 0x1c1   : > { %v2426_v43 = vadd.f32 %v879_v41, %v859_v8  ;;  %vm926_vm10 = vcmp.eq.f32.partialorder %v2352_v48, 6.0  ;;  %v2434_v50 = vsel %vm915_vm9, 1.0, %v2928_v5  ;;  %vm927_vm11 = vcmp.eq.f32.partialorder %v2364_v55, 6.0 }
 0x1c2   : > { %2962 = vst [vmem:[#allocation16_spill] sm:$0xff] %v2434_v50  ;;  %v2438_v24 = vsel %vm926_vm10, 1.0, %v2928_v5  ;;  %v1014_v39 = vmul.f32 %v2430_v49, %v2405_v37  ;;  %v2443_v52 = vsel %vm927_vm11, 1.0, %v2928_v5  ;;  %v1015_v61 = vmul.f32 %v2434_v50, %v2413_v7 }
 0x1c3   : > { %v1010_v59 = vmul.f32 %v2438_v24, %v2390_v6  ;;  %v1022_v62 = vmul.f32 %v2420_v27, %v2417_v31  ;;  %v1011_v53 = vmul.f32 %v2443_v52, %v2394_v0  ;;  %v1023_v54 = vmul.f32 %v2423_v42, %v2426_v43 }
 0x1c4   : > { %v1030_v57 = vmul.f32 %v2408_v29, %v2397_v13  ;;  %v1031_v47 = vmul.f32 %v2411_v28, %v2401_v30  ;;  %v610_v3 = vmul.f32 1.442695, %v606_v20  ;;  %v612_v4 = vmul.f32 1.442695, %v607_v34 }
 0x1c5   : > { %v1018_v63 = vadd.f32 %v1014_v39, %v1010_v59  ;;  %v728_v38 = vadd.f32 1.0, %v2375_v10  ;;  %v1019_v22 = vadd.f32 %v1015_v61, %v1011_v53  ;;  %v729_v23 = vadd.f32 1.0, %v2383_v35 }
 0x1c6   : > { %v792_v58 = vadd.f32 2.0, %v2375_v10  ;;  %v793_v9 = vadd.f32 2.0, %v2383_v35  ;;  %1681 = vpow2.f32 %v610_v3  ;;  %vm892_vm12 = vcmp.eq.f32.partialorder %v2375_v10, 3.0 }
 0x1c7   : > { %v1026_v56 = vadd.f32 %v1022_v62, %v1018_v63  ;;  %v732_v1 = vmul.f32 0.07692308, %v728_v38  ;;  %v1500_v2 = vadd.f32 -1.0, %v728_v38  ;;  %v1027_v12 = vadd.f32 %v1023_v54, %v1019_v22 }
 0x1c8   : > { %1683 = vpow2.f32 %v612_v4  ;;  %v733_v44 = vmul.f32 0.07692308, %v729_v23  ;;  %v1501_v20 = vadd.f32 -1.0, %v729_v23  ;;  %v1504_v16 = vadd.f32 -2.0, %v728_v38 }
 0x1c9   : > { %v1034_v46 = vadd.f32 %v1030_v57, %v1026_v56  ;;  %v736_v34 = vsub.f32 %v732_v1, %v2335_v33  ;;  %v744_v14 = vmul.f32 0.07692308, %v1500_v2  ;;  %v1035_v17 = vadd.f32 %v1031_v47, %v1027_v12 }
 0x1ca   : > { %v737_v18 = vsub.f32 %v733_v44, %v2343_v36  ;;  %v745_v19 = vmul.f32 0.07692308, %v1501_v20  ;;  %v1505_v60 = vadd.f32 -2.0, %v729_v23  ;;  %v768_v8 = vmul.f32 0.07692308, %v1504_v16 }
 0x1cb   : > { %v748_v25 = vsub.f32 %v2335_v33, %v744_v14  ;;  %v752_v21 = vmul.f32 13.0, %v736_v34  ;;  %v796_v32 = vmul.f32 0.07692308, %v792_v58  ;;  %v1174_v40 = vpack.c.bf16 %v1035_v17, %v1034_v46 }
 0x1cc   : > { %v749_v41 = vsub.f32 %v2343_v36, %v745_v19  ;;  %v753_v39 = vmul.f32 13.0, %v737_v18  ;;  %v769_v59 = vmul.f32 0.07692308, %v1505_v60  ;;  %v772_v62 = vsub.f32 %v2335_v33, %v768_v8 }
 0x1cd   : > { %v760_v61 = vmul.f32 13.0, %v748_v25  ;;  %v776_v53 = vmul.f32 6.5, %v752_v21  ;;  %v797_v54 = vmul.f32 0.07692308, %v793_v9  ;;  %1546 = vmatprep.subr.bf16.mxu1 %v1174_v40  ;;  %v800_v3 = vsub.f32 %v796_v32, %v2335_v33 }
 0x1ce   : > { %v761_v57 = vmul.f32 13.0, %v749_v41  ;;  %v773_v47 = vsub.f32 %v2343_v36, %v769_v59  ;;  %v777_v63 = vmul.f32 6.5, %v753_v39  ;;  %v1508_v44 = vadd.f32 -3.0, %v728_v38 }
 0x1cf   : > { %v780_v4 = vmul.f32 %v776_v53, %v736_v34  ;;  %v788_v22 = vmul.f32 %v776_v53, %v772_v62  ;;  %v801_v58 = vsub.f32 %v797_v54, %v2343_v36  ;;  %v804_v56 = vmul.f32 6.5, %v760_v61 }
 0x1d0   : > { %v781_v1 = vmul.f32 %v777_v63, %v737_v18  ;;  %v789_v2 = vmul.f32 %v777_v63, %v773_v47  ;;  %v805_v12 = vmul.f32 6.5, %v761_v57  ;;  %v1682_v20 = vpop.eup %1681  ;;  %v1509_v9 = vadd.f32 -3.0, %v729_v23 }
 0x1d1   : > { %v808_v46 = vmul.f32 %v804_v56, %v800_v3  ;;  %v816_v14 = vmul.f32 %v804_v56, %v748_v25  ;;  %v832_v16 = vmul.f32 4.3333335, %v780_v4  ;;  %v618_v19 = vadd.f32 1.0, %v1682_v20 }
 0x1d2   : > { %v1684_v17 = vpop.eup %1683  ;;  %v809_v60 = vmul.f32 %v805_v12, %v801_v58  ;;  %v817_v21 = vmul.f32 %v805_v12, %v749_v41  ;;  %v824_v8 = vmul.f32 0.07692308, %v1508_v44  ;;  %v825_v39 = vmul.f32 0.07692308, %v1509_v9 }
 0x1d3   : > { %v619_v32 = vadd.f32 1.0, %v1684_v17  ;;  %v812_v40 = vadd.f32 %v808_v46, %v788_v22  ;;  %v833_v59 = vmul.f32 4.3333335, %v781_v1  ;;  %1685 = vrcp.f32 %v618_v19 }
 0x1d4   : > { %v813_v61 = vadd.f32 %v809_v60, %v789_v2  ;;  %v828_v53 = vsub.f32 %v2335_v33, %v824_v8  ;;  %v2476_v54 = vmul.f32 %v832_v16, %v736_v34  ;;  %v829_v38 = vsub.f32 %v2343_v36, %v825_v39 }
 0x1d5   : > { %1687 = vrcp.f32 %v619_v32  ;;  %v2479_v23 = vmul.f32 %v833_v59, %v737_v18  ;;  %v848_v57 = vmul.f32 4.3333335, %v812_v40  ;;  %v864_v56 = vadd.f32 3.0, %v2375_v10 }
 0x1d6   : > { %v844_v63 = vmul.f32 %v832_v16, %v828_v53  ;;  %v849_v4 = vmul.f32 4.3333335, %v813_v61  ;;  %v865_v22 = vadd.f32 3.0, %v2383_v35  ;;  %v845_v12 = vmul.f32 %v833_v59, %v829_v38 }
 0x1d7   : > { %v852_v1 = vmul.f32 %v848_v57, %v800_v3  ;;  %v860_v44 = vmul.f32 %v848_v57, %v772_v62  ;;  %v876_v2 = vmul.f32 4.3333335, %v816_v14  ;;  %v868_v34 = vmul.f32 0.07692308, %v864_v56 }
 0x1d8   : > { %v853_v20 = vmul.f32 %v849_v4, %v801_v58  ;;  %v861_v46 = vmul.f32 %v849_v4, %v773_v47  ;;  %v869_v9 = vmul.f32 0.07692308, %v865_v22  ;;  %v877_v19 = vmul.f32 4.3333335, %v817_v21 }
 0x1d9   : > { %v2483_v17 = vadd.f32 %v852_v1, %v844_v63  ;;  %v2485_v18 = vmul.f32 %v876_v2, %v748_v25  ;;  %v872_v60 = vsub.f32 %v868_v34, %v2335_v33  ;;  %vm893_vm13 = vcmp.eq.f32.partialorder %v2383_v35, 3.0 }
 0x1da   : > { %v2488_v16 = vadd.f32 %v853_v20, %v845_v12  ;;  %v873_v8 = vsub.f32 %v869_v9, %v2343_v36  ;;  %v2493_v62 = vmul.f32 %v877_v19, %v749_v41  ;;  %v2496_v47 = vsel %vm892_vm12, 1.0, %v2928_v5 }
 0x1db   : > { %2963 = vst [vmem:[#allocation17_spill] sm:$0xff] %v2485_v18  ;;  %2965 = vst [vmem:[#allocation19_spill] sm:$0xff] %v2496_v47  ;;  %v2499_v3 = vsel %vm893_vm13, 1.0, %v2928_v5  ;;  %vm904_vm14 = vcmp.eq.f32.partialorder %v2375_v10, 4.0  ;;  %v880_v25 = vmul.f32 %v876_v2, %v872_v60  ;;  %vm905_vm15 = vcmp.eq.f32.partialorder %v2383_v35, 4.0 }
 0x1dc   : > { %2964 = vst [vmem:[#allocation18_spill] sm:$0xff] %v2493_v62  ;;  %v881_v58 = vmul.f32 %v877_v19, %v873_v8  ;;  %v2504_v14 = vsel %vm904_vm14, 1.0, %v2928_v5  ;;  %v2507_v21 = vsel %vm905_vm15, 1.0, %v2928_v5  ;;  %vm916_vm0 = vcmp.eq.f32.partialorder %v2375_v10, 5.0 }
 0x1dd   : > { %vm917_vm1 = vcmp.eq.f32.partialorder %v2383_v35, 5.0  ;;  %vm928_vm2 = vcmp.eq.f32.partialorder %v2375_v10, 6.0  ;;  %v1686_v41 = vpop.eup %1685  ;;  %v2512_v32 = vadd.f32 %v880_v25, %v860_v44  ;;  %v2517_v39 = vsel %vm916_vm0, 1.0, %v2928_v5 }
 0x1de   : > { %v2514_v40 = vadd.f32 %v881_v58, %v861_v46  ;;  %v2520_v59 = vsel %vm917_vm1, 1.0, %v2928_v5  ;;  %v626_v53 = vmul.f32 %v1686_v41, %v2305_v11  ;;  %vm929_vm3 = vcmp.eq.f32.partialorder %v2383_v35, 6.0 }
 0x1df   : > { %v1688_v61 = vpop.eup %1687  ;;  %v2525_v38 = vsel %vm928_vm2, 1.0, %v2928_v5  ;;  %v1016_v57 = vmul.f32 %v2517_v39, %v2483_v17  ;;  %v2531_v4 = vsel %vm929_vm3, 1.0, %v2928_v5  ;;  %v1017_v22 = vmul.f32 %v2520_v59, %v2488_v16 }
 0x1e0   : > { %2966 = vst [vmem:[#allocation20_spill] sm:$0xff] %v2525_v38  ;;  %v627_v63 = vmul.f32 %v1688_v61, %v2319_v15  ;;  %2967 = vst [vmem:[#allocation21_spill] sm:$0xff] %v2531_v4  ;;  %v1012_v56 = vmul.f32 %v2525_v38, %v2476_v54  ;;  %v1013_v11 = vmul.f32 %v2531_v4, %v2479_v23  ;;  %v614_v46 = vmul.f32 1.442695, %v608_v45 }
 0x1e1   : > { %v1024_v12 = vmul.f32 %v2504_v14, %v2512_v32  ;;  %v1025_v1 = vmul.f32 %v2507_v21, %v2514_v40  ;;  %v1032_v15 = vmul.f32 %v2496_v47, %v2485_v18  ;;  %v1033_v20 = vmul.f32 %v2499_v3, %v2493_v62 }
 0x1e2   : > { %v1158_v44 = vpack.c.bf16 %v627_v63, %v626_v53  ;;  %v1020_v2 = vadd.f32 %v1016_v57, %v1012_v56  ;;  %v1021_v34 = vadd.f32 %v1017_v22, %v1013_v11  ;;  %v616_v9 = vmul.f32 1.442695, %v609_v51 }
 0x1e3   : > { %vm938_vm4 = vcmp.eq.f32.partialorder %v2352_v48, 7.0  ;;  %vm939_vm5 = vcmp.eq.f32.partialorder %v2364_v55, 7.0  ;;  %1689 = vpow2.f32 %v614_v46  ;;  %v1042_v41 = vmul.f32 %v2438_v24, %v2405_v37 }
 0x1e4   : > { %1547 = vmatpush3.bf16.msra.mxu1 %v1158_v44  ;;  %v1028_v19 = vadd.f32 %v1024_v12, %v1020_v2  ;;  %v2554_v60 = vsel %vm938_vm4, 1.0, %v2928_v5  ;;  %v2557_v8 = vsel %vm939_vm5, 1.0, %v2928_v5  ;;  %v1029_v25 = vadd.f32 %v1025_v1, %v1021_v34 }
 0x1e5   : > { %1691 = vpow2.f32 %v616_v9  ;;  %v1038_v45 = vmul.f32 %v2554_v60, %v2390_v6  ;;  %v1039_v51 = vmul.f32 %v2557_v8, %v2394_v0  ;;  %v1043_v61 = vmul.f32 %v2443_v52, %v2413_v7 }
 0x1e6   : > { %v1036_v58 = vadd.f32 %v1032_v15, %v1028_v19  ;;  %v1050_v53 = vmul.f32 %v2430_v49, %v2417_v31  ;;  %v1037_v57 = vadd.f32 %v1033_v20, %v1029_v25  ;;  %v1051_v63 = vmul.f32 %v2434_v50, %v2426_v43 }
 0x1e7   : > { %v1058_v56 = vmul.f32 %v2420_v27, %v2397_v13  ;;  %v1059_v22 = vmul.f32 %v2423_v42, %v2401_v30  ;;  %v1046_v11 = vadd.f32 %v1042_v41, %v1038_v45  ;;  %v1047_v12 = vadd.f32 %v1043_v61, %v1039_v51 }
 0x1e8   : > { %v2577_v1 = vmul.f32 %v2408_v29, %v2390_v6  ;;  %v2581_v15 = vmul.f32 %v2411_v28, %v2394_v0  ;;  %v1175_v44 = vpack.c.bf16 %v1037_v57, %v1036_v58  ;;  %vm940_vm6 = vcmp.eq.f32.partialorder %v2375_v10, 7.0 }
 0x1e9   : > { %vm941_vm7 = vcmp.eq.f32.partialorder %v2383_v35, 7.0  ;;  %v1044_v2 = vmul.f32 %v2525_v38, %v2483_v17  ;;  %v1054_v20 = vadd.f32 %v1050_v53, %v1046_v11  ;;  %v1055_v46 = vadd.f32 %v1051_v63, %v1047_v12 }
 0x1ea   : > { %2968 = vst [vmem:[#allocation22_spill] sm:$0xff] %v2577_v1  ;;  %2969 = vst [vmem:[#allocation23_spill] sm:$0xff] %v2581_v15  ;;  %v2590_v9 = vsel %vm940_vm6, 1.0, %v2928_v5  ;;  %1548 = vmatprep.subr.bf16.mxu1 %v1175_v44  ;;  %v2593_v19 = vsel %vm941_vm7, 1.0, %v2928_v5  ;;  %v1045_v45 = vmul.f32 %v2531_v4, %v2488_v16  ;;  %v1052_v51 = vmul.f32 %v2517_v39, %v2512_v32 }
 0x1eb   : > { %v1040_v25 = vmul.f32 %v2590_v9, %v2476_v54  ;;  %v2601_v58 = vadd.f32 %v1058_v56, %v1054_v20  ;;  %v2603_v41 = vadd.f32 %v1059_v22, %v1055_v46  ;;  %v1041_v61 = vmul.f32 %v2593_v19, %v2479_v23 }
 0x1ec   : > { %v1053_v53 = vmul.f32 %v2520_v59, %v2514_v40  ;;  %v1060_v63 = vmul.f32 %v2504_v14, %v2485_v18  ;;  %v1061_v11 = vmul.f32 %v2507_v21, %v2493_v62  ;;  %v2615_v12 = vmul.f32 %v2496_v47, %v2476_v54 }
 0x1ed   : > { %v1048_v57 = vadd.f32 %v1044_v2, %v1040_v25  ;;  %v1690_v56 = vpop.eup %1689  ;;  %v1049_v44 = vadd.f32 %v1045_v45, %v1041_v61  ;;  %v2621_v20 = vmul.f32 %v2499_v3, %v2479_v23  ;;  %vm950_vm8 = vcmp.eq.f32.partialorder %v2352_v48, 8.0 }
 0x1ee   : > { %2970 = vst [vmem:[#allocation24_spill] sm:$0xff] %v2615_v12  ;;  %v620_v46 = vadd.f32 1.0, %v1690_v56  ;;  %vm951_vm9 = vcmp.eq.f32.partialorder %v2364_v55, 8.0  ;;  %v2626_v34 = vsel %vm950_vm8, 1.0, %v2928_v5  ;;  %v978_v22 = vmul.f32 %v2420_v27, %v2390_v6 }
 0x1ef   : > { %2971 = vst [vmem:[#allocation25_spill] sm:$0xff] %v2621_v20  ;;  %v1692_v2 = vpop.eup %1691  ;;  %v1056_v25 = vadd.f32 %v1052_v51, %v1048_v57  ;;  %v1057_v1 = vadd.f32 %v1053_v53, %v1049_v44  ;;  %v2631_v45 = vsel %vm951_vm9, 1.0, %v2928_v5  ;;  %v1066_v56 = vmul.f32 %v2626_v34, %v2390_v6 }
 0x1f0   : > { %v621_v26 = vadd.f32 1.0, %v1692_v2  ;;  %1693 = vrcp.f32 %v620_v46  ;;  %v1067_v51 = vmul.f32 %v2631_v45, %v2394_v0  ;;  %v1070_v53 = vmul.f32 %v2554_v60, %v2405_v37 }
 0x1f1   : > { %v2633_v61 = vadd.f32 %v1060_v63, %v1056_v25  ;;  %v2639_v57 = vadd.f32 %v1061_v11, %v1057_v1  ;;  %v1071_v44 = vmul.f32 %v2557_v8, %v2413_v7  ;;  %v1078_v2 = vmul.f32 %v2438_v24, %v2417_v31 }
 0x1f2   : > { %1695 = vrcp.f32 %v621_v26  ;;  %v1079_v63 = vmul.f32 %v2443_v52, %v2426_v43  ;;  %v1086_v46 = vmul.f32 %v2430_v49, %v2397_v13  ;;  %v1087_v26 = vmul.f32 %v2434_v50, %v2401_v30 }
 0x1f3   : > { %2972 = vst [vmem:[#allocation26_spill] sm:$0xff] %v2633_v61  ;;  %2973 = vst [vmem:[#allocation27_spill] sm:$0xff] %v2639_v57  ;;  %v1074_v11 = vadd.f32 %v1070_v53, %v1066_v56  ;;  %v1075_v25 = vadd.f32 %v1071_v44, %v1067_v51  ;;  %v979_v5 = vmul.f32 %v2423_v42, %v2394_v0  ;;  %vm952_vm10 = vcmp.eq.f32.partialorder %v2375_v10, 8.0 }
 0x1f4   : > { %v982_v12 = vmul.f32 %v2408_v29, %v2405_v37  ;;  %v983_v20 = vmul.f32 %v2411_v28, %v2413_v7  ;;  %vm953_vm11 = vcmp.eq.f32.partialorder %v2383_v35, 8.0  ;;  %v2974_v56 = vmov 0.0  }
 0x1f5   : > { %v1082_v15 = vadd.f32 %v1078_v2, %v1074_v11  ;;  %v1083_v50 = vadd.f32 %v1079_v63, %v1075_v25  ;;  %v2666_v51 = vsel %vm952_vm10, 1.0, %v2974_v56  ;;  %v2673_v1 = vsel %vm953_vm11, 1.0, %v2974_v56 }
 0x1f6   : > { %v2668_v53 = vadd.f32 %v982_v12, %v978_v22  ;;  %v2670_v44 = vadd.f32 %v983_v20, %v979_v5  ;;  %v1068_v61 = vmul.f32 %v2666_v51, %v2476_v54  ;;  %v1069_v2 = vmul.f32 %v2673_v1, %v2479_v23 }
 0x1f7   : > { %v2677_v57 = vadd.f32 %v1086_v46, %v1082_v15  ;;  %v2679_v10 = vadd.f32 %v1087_v26, %v1083_v50  ;;  %v1072_v63 = vmul.f32 %v2590_v9, %v2483_v17  ;;  %v1073_v12 = vmul.f32 %v2593_v19, %v2488_v16 }
 0x1f8   : > { %2975 = vst [vmem:[#allocation28_spill] sm:$0xff] %v2668_v53  ;;  %2976 = vst [vmem:[#allocation29_spill] sm:$0xff] %v2670_v44  ;;  %v1080_v22 = vmul.f32 %v2525_v38, %v2512_v32  ;;  %v1081_v15 = vmul.f32 %v2531_v4, %v2514_v40  ;;  %v1088_v46 = vmul.f32 %v2517_v39, %v2485_v18  ;;  %vm962_vm12 = vcmp.eq.f32.partialorder %v2352_v48, 9.0 }
 0x1f9   : > { %v1076_v20 = vadd.f32 %v1072_v63, %v1068_v61  ;;  %v1089_v26 = vmul.f32 %v2520_v59, %v2493_v62  ;;  %v1077_v25 = vadd.f32 %v1073_v12, %v1069_v2  ;;  %v980_v5 = vmul.f32 %v2504_v14, %v2476_v54 }
 0x1fa   : > { %v1694_v11 = vpop.eup %1693  ;;  %v981_v53 = vmul.f32 %v2507_v21, %v2479_v23  ;;  %v984_v44 = vmul.f32 %v2496_v47, %v2483_v17  ;;  %v985_v50 = vmul.f32 %v2499_v3, %v2488_v16  ;;  %vm963_vm13 = vcmp.eq.f32.partialorder %v2364_v55, 9.0 }
 0x1fb   : > { %v628_v61 = vmul.f32 %v1694_v11, %v2335_v33  ;;  %v1084_v63 = vadd.f32 %v1080_v22, %v1076_v20  ;;  %v1085_v12 = vadd.f32 %v1081_v15, %v1077_v25  ;;  %v2718_v47 = vsel %vm962_vm12, 1.0, %v2974_v56 }
 0x1fc   : > { %v1696_v4 = vpop.eup %1695  ;;  %v2710_v62 = vadd.f32 %v984_v44, %v980_v5  ;;  %v2715_v18 = vadd.f32 %v985_v50, %v981_v53  ;;  %v2721_v33 = vsel %vm963_vm13, 1.0, %v2974_v56  ;;  %v1099_v53 = vmul.f32 %v2631_v45, %v2413_v7 }
 0x1fd   : > { %v629_v2 = vmul.f32 %v1696_v4, %v2343_v36  ;;  %v2713_v38 = vadd.f32 %v1088_v46, %v1084_v63  ;;  %v1093_v20 = vadd.f32 %v1089_v26, %v1085_v12  ;;  %v1094_v36 = vmul.f32 %v2718_v47, %v2390_v6 }
 0x1fe   : > { %v1095_v48 = vmul.f32 %v2721_v33, %v2394_v0  ;;  %v1167_v55 = vpack.c.bf16 %v2715_v18, %v2710_v62  ;;  %v1098_v4 = vmul.f32 %v2626_v34, %v2405_v37  ;;  %v1106_v44 = vmul.f32 %v2554_v60, %v2417_v31 }
 0x1ff   : > { %v1159_v22 = vpack.c.bf16 %v629_v2, %v628_v61  ;;  %v1183_v5 = vpack.c.bf16 %v1093_v20, %v2713_v38  ;;  %v1107_v15 = vmul.f32 %v2557_v8, %v2426_v43  ;;  %v1114_v50 = vmul.f32 %v2438_v24, %v2397_v13  ;;  %v2978_v38 = vld [vmem:[#allocation16_spill] sm:$0xff] }
 0x200   : > { %v1115_v46 = vmul.f32 %v2443_v52, %v2401_v30  ;;  %v2977_v26 = vpack.c.bf16 %v2603_v41, %v2601_v58  ;;  %v1102_v11 = vadd.f32 %v1098_v4, %v1094_v36  ;;  %v1103_v25 = vadd.f32 %v1099_v53, %v1095_v48  ;;  %v2983_v36 = vld [vmem:[#allocation27_spill] sm:$0xff] }
 0x201   : > { %1549 = vmatpush3.bf16.msra.mxu1 %v1159_v22  ;;  %v990_v61 = vmul.f32 %v2430_v49, %v2390_v6  ;;  %v991_v63 = vmul.f32 %v2978_v38, %v2394_v0  ;;  %v994_v2 = vmul.f32 %v2420_v27, %v2405_v37  ;;  %v995_v24 = vmul.f32 %v2423_v42, %v2413_v7  ;;  %v2979_v22 = vld [vmem:[#allocation15_spill] sm:$0xff]  ;;  %v2981_v0 = vld [vmem:[#allocation22_spill] sm:$0xff] }
 0x202   : > { %1550 = vmatprep.subr.bf16.mxu1 %v2977_v26  ;;  %v1002_v52 = vmul.f32 %v2408_v29, %v2417_v31  ;;  %v1003_v58 = vmul.f32 %v2411_v28, %v2426_v43  ;;  %v1110_v41 = vadd.f32 %v1106_v44, %v1102_v11  ;;  %v1111_v12 = vadd.f32 %v1107_v15, %v1103_v25  ;;  %v2980_v6 = vld [vmem:[#allocation23_spill] sm:$0xff]  ;;  %v2984_v28 = vld [vmem:[#allocation26_spill] sm:$0xff] }
 0x203   : > { %vm964_vm14 = vcmp.eq.f32.partialorder %v2979_v22, 9.0  ;;  %vm965_vm15 = vcmp.eq.f32.partialorder %v2383_v35, 9.0  ;;  %v2982_v49 = vpack.c.bf16 %v2980_v6, %v2981_v0  ;;  %v998_v27 = vadd.f32 %v994_v2, %v990_v61 }
 0x204   : > { %v999_v20 = vadd.f32 %v995_v24, %v991_v63  ;;  %v2763_v42 = vsel %vm964_vm14, 1.0, %v2974_v56  ;;  %v2766_v29 = vsel %vm965_vm15, 1.0, %v2974_v56  ;;  %v2985_v48 = vpack.c.bf16 %v2983_v36, %v2984_v28  ;;  %v2991_v36 = vld [vmem:[#allocation20_spill] sm:$0xff] }
 0x205   : > { %1551 = vmatpush3.bf16.msra.mxu1 %v2982_v49  ;;  %v1118_v4 = vadd.f32 %v1114_v50, %v1110_v41  ;;  %v1119_v53 = vadd.f32 %v1115_v46, %v1111_v12  ;;  %v1096_v35 = vmul.f32 %v2763_v42, %v2476_v54  ;;  %v1097_v44 = vmul.f32 %v2766_v29, %v2479_v23  ;;  %v2986_v50 = vld [vmem:[#allocation25_spill] sm:$0xff]  ;;  %v2987_v46 = vld [vmem:[#allocation24_spill] sm:$0xff] }
 0x206   : > { %1552 = vmatprep.subr.bf16.mxu1 %v2985_v48  ;;  %v1006_v15 = vadd.f32 %v1002_v52, %v998_v27  ;;  %v1007_v26 = vadd.f32 %v1003_v58, %v999_v20  ;;  %v1100_v11 = vmul.f32 %v2666_v51, %v2483_v17  ;;  %v1101_v25 = vmul.f32 %v2673_v1, %v2488_v16  ;;  %v2990_v20 = vld [vmem:[#allocation17_spill] sm:$0xff]  ;;  %v2992_v48 = vld [vmem:[#allocation18_spill] sm:$0xff] }
 0x207   : > { %v1186_v61 = vpack.c.bf16 %v1119_v53, %v1118_v4  ;;  %v1108_v38 = vmul.f32 %v2590_v9, %v2512_v32  ;;  %v2988_v63 = vpack.c.bf16 %v2986_v50, %v2987_v46  ;;  %v1109_v52 = vmul.f32 %v2593_v19, %v2514_v40 }
 0x208   : > { %v1170_v2 = vpack.c.bf16 %v1007_v26, %v1006_v15  ;;  %v1104_v24 = vadd.f32 %v1100_v11, %v1096_v35  ;;  %v1105_v41 = vadd.f32 %v1101_v25, %v1097_v44  ;;  %v2989_v58 = vpack.c.bf16 %v2679_v10, %v2677_v57  ;;  %v2993_v10 = vld [vmem:[#allocation21_spill] sm:$0xff] }
 0x209   : > { %1553 = vmatpush3.bf16.msra.mxu1 %v2988_v63  ;;  %v992_v12 = vmul.f32 %v2517_v39, %v2476_v54  ;;  %v993_v22 = vmul.f32 %v2520_v59, %v2479_v23  ;;  %v996_v6 = vmul.f32 %v2504_v14, %v2483_v17  ;;  %v997_v0 = vmul.f32 %v2507_v21, %v2488_v16  ;;  %v2994_v54 = vld [vmem:[#allocation19_spill] sm:$0xff]  ;;  %v2995_v14 = vld [vmem:[#allocation29_spill] sm:$0xff]  ;;  %v2996_v59 = vld [vmem:[#allocation28_spill] sm:$0xff] }
 0x20a   : > { %1554 = vmatprep.subr.bf16.mxu1 %v2989_v58  ;;  %v1112_v49 = vadd.f32 %v1108_v38, %v1104_v24  ;;  %v1113_v27 = vadd.f32 %v1109_v52, %v1105_v41  ;;  %v1116_v28 = vmul.f32 %v2991_v36, %v2990_v20  ;;  %v1117_v57 = vmul.f32 %v2993_v10, %v2992_v48 }
 0x20b   : > { %v1000_v4 = vadd.f32 %v996_v6, %v992_v12  ;;  %v1001_v53 = vadd.f32 %v997_v0, %v993_v22  ;;  %v1004_v39 = vmul.f32 %v2994_v54, %v2512_v32  ;;  %v1005_v23 = vmul.f32 %v2499_v3, %v2514_v40 }
 0x20c   : > { %v2997_v35 = vpack.c.bf16 %v2995_v14, %v2996_v59  ;;  %v1120_v21 = vadd.f32 %v1116_v28, %v1112_v49  ;;  %v1121_v44 = vadd.f32 %v1117_v57, %v1113_v27  ;;  %v1123_v25 = vmul.f32 %v2721_v33, %v2413_v7  ;;  %v1672_v57 = vld [vmem:[#allocation9 + $0x8] ss:$0 sps:$4 sm:$0xff]  }
 0x20d   : > { %v1008_v15 = vadd.f32 %v1004_v39, %v1000_v4  ;;  %v1009_v26 = vadd.f32 %v1005_v23, %v1001_v53  ;;  %v1127_v38 = vmul.f32 %v2631_v45, %v2426_v43  ;;  %v1124_v50 = vmul.f32 %v2763_v42, %v2483_v17 }
 0x20e   : > { %1555 = vmatpush3.bf16.msra.mxu1 %v2997_v35  ;;  %v1187_v11 = vpack.c.bf16 %v1121_v44, %v1120_v21  ;;  %v1125_v46 = vmul.f32 %v2766_v29, %v2488_v16  ;;  %v1128_v63 = vmul.f32 %v2666_v51, %v2512_v32  ;;  %v1122_v7 = vmul.f32 %v2718_v47, %v2405_v37 }
 0x20f   : > { %1556 = vmatprep.subr.bf16.mxu1 %v1183_v5  ;;  %v1171_v3 = vpack.c.bf16 %v1009_v26, %v1008_v15  ;;  %v1129_v5 = vmul.f32 %v2673_v1, %v2514_v40  ;;  %v1126_v17 = vmul.f32 %v2626_v34, %v2417_v31  ;;  %v1136_v16 = vmul.f32 %v2590_v9, %v2990_v20 }
 0x210   : > { %v1132_v24 = vadd.f32 %v1128_v63, %v1124_v50  ;;  %v1137_v52 = vmul.f32 %v2593_v19, %v2992_v48  ;;  %v1131_v58 = vadd.f32 %v1127_v38, %v1123_v25  ;;  %v1144_v18 = vmul.f32 %v2763_v42, %v2512_v32 }
 0x211   : > { %v1133_v41 = vadd.f32 %v1129_v5, %v1125_v46  ;;  %v1145_v37 = vmul.f32 %v2766_v29, %v2514_v40  ;;  %v1130_v12 = vadd.f32 %v1126_v17, %v1122_v7  ;;  %v1135_v9 = vmul.f32 %v2557_v8, %v2401_v30 }
 0x212   : > { %1557 = vmatpush3.bf16.msra.mxu1 %v1167_v55  ;;  %v1140_v62 = vadd.f32 %v1136_v16, %v1132_v24  ;;  %v1149_v19 = vmul.f32 %v2673_v1, %v2992_v48  ;;  %v1156_v32 = vmul.f32 %v2763_v42, %v2990_v20  ;;  %v1134_v40 = vmul.f32 %v2554_v60, %v2397_v13 }
 0x213   : > { %1558 = vmatprep.subr.bf16.mxu1 %v1186_v61  ;;  %v1141_v55 = vadd.f32 %v1137_v52, %v1133_v41  ;;  %v1148_v61 = vmul.f32 %v2666_v51, %v2990_v20  ;;  %v1139_v0 = vadd.f32 %v1135_v9, %v1131_v58  ;;  %v1157_v51 = vmul.f32 %v2766_v29, %v2992_v48 }
 0x214   : > { %v1153_v49 = vadd.f32 %v1149_v19, %v1145_v37  ;;  %v1138_v27 = vadd.f32 %v1134_v40, %v1130_v12  ;;  %v1143_v42 = vmul.f32 %v2721_v33, %v2426_v43  ;;  %v1142_v60 = vmul.f32 %v2718_v47, %v2417_v31 }
 0x215   : > { %v1191_v22 = vpack.c.bf16 %v1141_v55, %v1140_v62  ;;  %v1152_v6 = vadd.f32 %v1148_v61, %v1144_v18  ;;  %v1199_v36 = vpack.c.bf16 %v1157_v51, %v1156_v32  ;;  %v1147_v29 = vmul.f32 %v2631_v45, %v2401_v30 }
 0x216   : > { %1559 = vmatpush3.bf16.msra.mxu1 %v1170_v2  ;;  %v2998_v2 = vld [vmem:[#allocation14_spill] sm:$0xff]  ;;  %v1190_v28 = vpack.c.bf16 %v1139_v0, %v1138_v27  ;;  %vm1863_vm0 = vmmov 0   ;;  %v1146_v20 = vmul.f32 %v2626_v34, %v2397_v13  ;;  %v1155_v31 = vmul.f32 %v2721_v33, %v2401_v30 }
 0x217   : > { %1560 = vmatprep.subr.bf16.mxu1 %v1187_v11  ;;  %v1538_v8 = vcombine.low %v2998_v2, %v2998_v2  ;;  %v1195_v1 = vpack.c.bf16 %v1153_v49, %v1152_v6  ;;  %v1151_v48 = vadd.f32 %v1147_v29, %v1143_v42  ;;  %v1154_v45 = vmul.f32 %v2718_v47, %v2397_v13 }
 0x218   : > { %v1150_v10 = vadd.f32 %v1146_v20, %v1142_v60  ;;  %vm1236_vm1 = vcmask 785408  }
 0x219   : > { %v1198_v34 = vpack.c.bf16 %v1155_v31, %v1154_v45 }
 0x21a   : > { %1561 = vmatpush3.bf16.msra.mxu1 %v1171_v3  ;;  %v1194_v43 = vpack.c.bf16 %v1151_v48, %v1150_v10 }
 0x21b   : > { %1575 = vmatprep.subr.bf16.mxu1 %v2974_v56 }
 0x21d   : > { %1273 = vmatmul.mubr.bf16.vlgmr.msra.gmra.mrb[0].mxu1 %v1538_v8 }
 0x21e   : > { %1576 = vmatpush3.bf16.msra.mxu1 %v1190_v28  ;;  %1587 = vmatprep.mubr.msk.bf16.mxu1 %vm1863_vm0, %v2974_v56 }
 0x21f   : > { %1577 = vmatprep.subr.bf16.mxu1 %v2974_v56 }
 0x222   : > { %1578 = vmatpush3.bf16.msra.mxu1 %v1191_v22 }
 0x223   : > { %1579 = vmatprep.subr.bf16.mxu1 %v2974_v56 }
 0x226   : > { %1580 = vmatpush3.bf16.msra.mxu1 %v1194_v43 }
 0x227   : > { %1581 = vmatprep.subr.bf16.mxu1 %v2974_v56 }
 0x22a   : > { %1582 = vmatpush3.bf16.msra.mxu1 %v1195_v1 }
 0x22b   : > { %1583 = vmatprep.subr.bf16.mxu1 %v2974_v56 }
 0x22e   : > { %1584 = vmatpush3.bf16.msra.mxu1 %v1198_v34 }
 0x22f   : > { %1585 = vmatprep.subr.bf16.mxu1 %v2974_v56 }
 0x232   : > { %1586 = vmatpush3.bf16.msra.mxu1 %v1199_v36 }
 0x235   : > { %1588 = vmatmul.mubr.msk.bf16.vlgmr.msra.gmra.mrb[4].mxu1 %vm1236_vm1, %v1672_v57 }
 0x2f0   : > { %v1562_v4 = vpop.f32.mrb[0].mxu1 }
 0x2f1   : > { %v1563_v53 = vpop.f32.mrb[1].mxu1 }
 0x2f2   : > { %v1564_v30 = vadd.f32 %v1563_v53, %v1562_v4  ;;  %v1565_v33 = vpop.f32.mrb[2].mxu1 }
 0x2f3   : > { %v1566_v54 = vpop.f32.mrb[3].mxu1 }
 0x308   : > { %v1314_v13 = vpop.f32.mrb[4].mxu1 }
 0x309   : > { %v1315_v47 = vadd.f32 %v1564_v30, %v1314_v13  ;;  %v1589_v39 = vpop.f32.mrb[5].mxu1 }
 0x30a   : > { %v1317_v56 = vpop.f32.mrb[6].mxu1 }
 0x30b   : > { %1320 = vst [vmem:[%s214_s19] sm:$0xff] %v1315_v47  ;;  %v1590_v23 = vpop.f32.mrb[7].mxu1 }
 0x30c   : > { %1796 = shalt.err (!%p1793_p5)
}
 0x30d   : > { %s1797_s9 = scalar_lea.hbm %s2873_s28, 128  ;;  %s1801_s4 = scalar_lea.hbm %s2920_s3, 256 }
 0x30e   : > { %p1798_p11 = scmp.ne.s32.totalorder %s2873_s28, %s1797_s9  ;;  %p1802_p6 = scmp.lt.u32.totalorder %s2873_s28, %s2920_s3 }
 0x30f   : > { %p1803_p13 = scmp.lt.u32.totalorder %s1801_s4, %s1797_s9  ;;  %p1805_p7 = scmp.lt.u32.totalorder %s1797_s9, %s2873_s28 }
 0x310   : > { %p1799_p12 = pnand %p1798_p11, %p2999_p9 }
 0x311   : > { %p1804_p8 = por %p1803_p13, %p1802_p6 }
 0x312   : > { %p1800_p3 = pneg %p1799_p12 }
 0x313   : > { %p1806_p10 = por %p1805_p7, %p1804_p8 }
 0x315   : > { %p1807_p1 = pnand %p1806_p10, %p1800_p3 }
 0x317   : > { %1810 = shalt.err (!%p1807_p1)
}
 0x318   : > { %1601 = dma.vmem_to_hbm [thread:$0]  (%p2999_p9), %s2875_s20, 128, %s2873_s28, %s1322_s22  }
 0x319 PF: > { %s1347_s7 = sand.u32 1, %s1841_s12   ;;  %p3000_p4 = scmp.ne.s32.totalorder %s2949_s25, 0 }
 0x31a   : > { %p3001_p0 = scmp.ge.s32.totalorder %s1853_s15, 2  ;;  %s1348_s23 = scalar_lea.sflag [#allocation6], %s1347_s7 }
 0x31c   : > { %p1615_p2 = pnand %p3001_p0, %p3000_p4 }
 0x31e   : > { %1836 = dma.done.wait (!%p1615_p2), %s1348_s23, 128  }
 0x31f   : > { %1838 = vsyncadd (!%p1615_p2), %s1348_s23, 4294967168  ;;  %p17_p5 = scmp.ge.s32.totalorder %s1910_s18, 4   ;;  %s3002_s12 = smov %s1845_s13 }
 0x320   : > { %s3003_s13 = smov %s1849_s14  ;;  %s3004_s14 = smov %s1922_s21 }
 0x321   : > { %s3005_s15 = smov %s1910_s18  ;;  %19 = sbr.rel (!%p17_p5) target bundleno = 6 (0x6), region = 85 }
 0x328   :  { %1353 = vsyncpa [#allocation5], 1 }
 0x329   :  { %1355 = vsyncpa [#allocation5 + $0x1], 1 }
 0x32a   :  { %1356 = vsyncpa [#allocation8], 1 }
 0x32b   :  { %1357 = vsyncpa [#allocation6], 1 }
 0x32c   :  { %1359 = vsyncpa [#allocation6 + $0x1], 1 }

</bundles_post_ra>
